<compile_context>
chip_gen: v5e
topology: v5e:2x2
jax: 0.10.0
libtpu: 0.0.40
codegen_flags: <defaults>
</compile_context>

<pallas_src>
import jax
import jax.numpy as jnp
from jax.experimental import pallas as pl
from jax.experimental.pallas import tpu as pltpu

# ---- QLNet hyper-parameters (from the PyTorch module defaults) --------------
IN_DIM_MAX = 10
ATTR_DIM = 6
HIDDEN = 256
OUT_DIM = 4
MA_NUM = 22
FEA_DIM = IN_DIM_MAX * ATTR_DIM            # 60
IN_FEATURES = MA_NUM * FEA_DIM             # 1320  (kernel contraction dim, unpadded)

OUT_PAD = 128                              # lane-dense output slab (real logits = first 4)
NEG_SLOPE = 0.01                           # nn.LeakyReLU / F.leaky_relu_ default
DEFAULT_TILE_B_CAP = 1024                  # max rows per grid step (review #2)


def _round_up(x, m):
    return (x + m - 1) // m * m


def _leaky_relu(x):
    return jnp.where(x > 0, x, NEG_SLOPE * x)


# --------------------------------- kernel ------------------------------------
def qlnet_kernel(x_ref,
                 w0_ref, b0_ref,
                 w1_ref, b1_ref,
                 w2_ref, b2_ref,
                 w3_ref, b3_ref,
                 o_ref):
    """One batch tile through the whole MLP: 4 MXU matmuls (bf16 in, f32 acc) + LeakyReLU."""
    # In-kernel cast: x is streamed from HBM exactly once as f32 and fed to the
    # MXU as bf16 (review #1).
    h = x_ref[...].astype(jnp.bfloat16)                               # (tile_b, 1320)

    h = jnp.dot(h, w0_ref[...], preferred_element_type=jnp.float32) + b0_ref[...]
    h = _leaky_relu(h).astype(jnp.bfloat16)

    h = jnp.dot(h, w1_ref[...], preferred_element_type=jnp.float32) + b1_ref[...]
    h = _leaky_relu(h).astype(jnp.bfloat16)

    h = jnp.dot(h, w2_ref[...], preferred_element_type=jnp.float32) + b2_ref[...]
    h = _leaky_relu(h).astype(jnp.bfloat16)

    h = jnp.dot(h, w3_ref[...], preferred_element_type=jnp.float32) + b3_ref[...]
    # QLNet.forward applies F.leaky_relu_ to the network output.
    o_ref[...] = _leaky_relu(h).astype(o_ref.dtype)                   # (tile_b, 128) bf16


# ------------------------------- tiling logic ---------------------------------
def _choose_tiling(batch, cap):
    """Balanced batch tiling (review #3 + #9).

    * 16-row granularity (bf16 output sublane packing).
    * waste bounded to ~16 rows per tile instead of padding to a fixed 256/512.
    * at least 2 grid steps when batch >= 64 so v7x megacore splits the work.
    """
    batch16 = _round_up(max(batch, 1), 16)
    min_tiles = 2 if batch16 >= 64 else 1
    num_tiles = max(pl.cdiv(batch16, cap), min_tiles)
    tile_b = _round_up(pl.cdiv(batch16, num_tiles), 16)
    num_tiles = pl.cdiv(batch16, tile_b)
    batch_p = num_tiles * tile_b
    return tile_b, num_tiles, batch_p


# --------------------------------- wrapper ------------------------------------
def qlnet_forward(state, packed_params, tile_b_cap=DEFAULT_TILE_B_CAP):
    """state: (batch, ma_num, in_dim_max, attr_dim) float32. Returns (batch, OUT_DIM) f32."""
    batch = state.shape[0]
    x = state.reshape(batch, IN_FEATURES)
    if x.dtype != jnp.float32:
        x = x.astype(jnp.float32)

    tile_b, num_tiles, batch_p = _choose_tiling(batch, tile_b_cap)
    if batch_p != batch:
        # Row-only pad (at most ~16 garbage rows per tile; sliced off below).
        x = jnp.pad(x, ((0, batch_p - batch), (0, 0)))

    (w0, b0), (w1, b1), (w2, b2), (w3, b3) = packed_params

    def resident(shape):
        # Full-array block + constant index map -> DMA'd once, stays VMEM-resident
        # across all grid steps.
        return pl.BlockSpec(shape, lambda i: (0, 0))

    in_specs = [
        pl.BlockSpec((tile_b, IN_FEATURES), lambda i: (i, 0)),    # streamed f32 activations
        resident((IN_FEATURES, HIDDEN)), resident((1, HIDDEN)),   # layer 0
        resident((HIDDEN, HIDDEN)), resident((1, HIDDEN)),        # layer 1
        resident((HIDDEN, HIDDEN)), resident((1, HIDDEN)),        # layer 2
        resident((HIDDEN, OUT_PAD)), resident((1, OUT_PAD)),      # output layer (padded to 128)
    ]
    out_spec = pl.BlockSpec((tile_b, OUT_PAD), lambda i: (i, 0))

    flops = 2 * batch_p * (IN_FEATURES * HIDDEN + 2 * HIDDEN * HIDDEN + HIDDEN * OUT_PAD)
    weight_bytes = sum(int(w.size) * w.dtype.itemsize + int(b.size) * b.dtype.itemsize
                       for w, b in packed_params)
    bytes_accessed = (batch_p * IN_FEATURES * 4        # x read once as f32
                      + weight_bytes
                      + batch_p * OUT_PAD * 2)         # bf16 output slab

    out = pl.pallas_call(
        qlnet_kernel,
        out_shape=jax.ShapeDtypeStruct((batch_p, OUT_PAD), jnp.bfloat16),
        grid=(num_tiles,),
        in_specs=in_specs,
        out_specs=out_spec,
        compiler_params=pltpu.CompilerParams(
            dimension_semantics=("parallel",),          # megacore split on v7x
            vmem_limit_bytes=32 * 1024 * 1024),         # ~13 MiB used at tile_b=1024
        cost_estimate=pl.CostEstimate(
            flops=int(flops), transcendentals=0, bytes_accessed=int(bytes_accessed)),
    )(x, w0, b0, w1, b1, w2, b2, w3, b3)

    return out[:batch, :OUT_DIM].astype(jnp.float32)


# ---------------------------- parameter handling -----------------------------
def init_params(key):
    """PyTorch-style uniform(-1/sqrt(fan_in), 1/sqrt(fan_in)) init.

    Logical (unpadded) f32 params; weights stored (in_features, out_features),
    biases (1, out_features).
    """
    dims = [IN_FEATURES, HIDDEN, HIDDEN, HIDDEN, OUT_DIM]
    params = []
    for i in range(4):
        fan_in, fan_out = dims[i], dims[i + 1]
        key, kw, kb = jax.random.split(key, 3)
        bound = float(fan_in) ** -0.5
        w = jax.random.uniform(kw, (fan_in, fan_out), jnp.float32, -bound, bound)
        b = jax.random.uniform(kb, (1, fan_out), jnp.float32, -bound, bound)
        params.append((w, b))
    return params


def pack_params(params):
    """Cast logical params into the kernel layout: bf16 weights, f32 biases.
    Only the output layer is padded (4 -> 128 columns, zeros); K stays 1320."""
    (w0, b0), (w1, b1), (w2, b2), (w3, b3) = params
    w0p = w0.astype(jnp.bfloat16)                                      # (1320, 256)
    w1p = w1.astype(jnp.bfloat16)                                      # (256, 256)
    w2p = w2.astype(jnp.bfloat16)                                      # (256, 256)
    w3p = jnp.pad(w3, ((0, 0), (0, OUT_PAD - OUT_DIM))).astype(jnp.bfloat16)   # (256, 128)
    b0p = b0.astype(jnp.float32)
    b1p = b1.astype(jnp.float32)
    b2p = b2.astype(jnp.float32)
    b3p = jnp.pad(b3, ((0, 0), (0, OUT_PAD - OUT_DIM))).astype(jnp.float32)    # (1, 128)
    return [(w0p, b0p), (w1p, b1p), (w2p, b2p), (w3p, b3p)]


# -------------------------------- references ---------------------------------
def qlnet_reference_packed(state, packed_params):
    """Pure-JAX reference with the SAME mixed-precision math as the kernel
    (bf16 activations/weights, f32 accumulation, bf16 final store)."""
    batch = state.shape[0]
    h = state.reshape(batch, IN_FEATURES).astype(jnp.float32).astype(jnp.bfloat16)
    for (w, b) in packed_params:
        h = jnp.dot(h, w, preferred_element_type=jnp.float32) + b
        h = _leaky_relu(h)
        h = h.astype(jnp.bfloat16)       # kernel rounds inter-layer activations AND the final store
    return h[:, :OUT_DIM].astype(jnp.float32)


def qlnet_reference_f32(state, params):
    """Full-precision (f32) reference matching the original PyTorch forward."""
    x = state.reshape(state.shape[0], IN_FEATURES).astype(jnp.float32)
    (w0, b0), (w1, b1), (w2, b2), (w3, b3) = params
    h = _leaky_relu(x @ w0 + b0)
    h = _leaky_relu(h @ w1 + b1)
    h = _leaky_relu(h @ w2 + b2)
    h = _leaky_relu(h @ w3 + b3)
    return h


if __name__ == "__main__":
    key = jax.random.PRNGKey(0)
    k_state, k_params, k_state2 = jax.random.split(key, 3)

    params = init_params(k_params)
    packed = pack_params(params)

    # ---- primary check: small batch, single grid step ----
    batch = 8
    state = jax.random.normal(
        k_state, (batch, MA_NUM, IN_DIM_MAX, ATTR_DIM), dtype=jnp.float32)

    out = jax.block_until_ready(qlnet_forward(state, packed))
    assert out.shape == (batch, OUT_DIM)

    ref_mixed = qlnet_reference_packed(state, packed)
    ref_f32 = qlnet_reference_f32(state, params)
    # Tight check against the mixed-precision reference (same math as the kernel).
    assert jnp.allclose(out, ref_mixed, atol=2e-3, rtol=2e-3), "mismatch vs bf16 reference"
    # Loose check against the full-f32 PyTorch-equivalent reference (bf16 weight/act quantization).
    assert jnp.allclose(out, ref_f32, atol=1e-1, rtol=1e-1), "mismatch vs f32 reference"

    # ---- secondary check: unaligned batch, >=2 grid steps (megacore / padding path) ----
    batch2 = 80
    state2 = jax.random.normal(
        k_state2, (batch2, MA_NUM, IN_DIM_MAX, ATTR_DIM), dtype=jnp.float32)
    out2 = jax.block_until_ready(qlnet_forward(state2, packed))
    assert out2.shape == (batch2, OUT_DIM)
    assert jnp.allclose(out2, qlnet_reference_packed(state2, packed),
                        atol=2e-3, rtol=2e-3), "mismatch vs bf16 reference (multi-tile)"

    print("KERNEL_OK")
</pallas_src>

<mosaic_0001>
module attributes {stable_mosaic.version = 11 : i64} {
  func.func @qlnet_kernel(%arg0: i32, %arg1: memref<16x1320xf32, #tpu.memory_space<vmem>>, %arg2: memref<1320x256xbf16, #tpu.memory_space<vmem>>, %arg3: memref<1x256xf32, #tpu.memory_space<vmem>>, %arg4: memref<256x256xbf16, #tpu.memory_space<vmem>>, %arg5: memref<1x256xf32, #tpu.memory_space<vmem>>, %arg6: memref<256x256xbf16, #tpu.memory_space<vmem>>, %arg7: memref<1x256xf32, #tpu.memory_space<vmem>>, %arg8: memref<256x128xbf16, #tpu.memory_space<vmem>>, %arg9: memref<1x128xf32, #tpu.memory_space<vmem>>, %arg10: memref<16x128xbf16, #tpu.memory_space<vmem>>) attributes {dimension_semantics = [#tpu.dimension_semantics<parallel>], iteration_bounds = array<i64: 1>, scalar_prefetch = 0 : i64, scratch_operands = 0 : i64, tpu.core_type = #tpu.core_type<tc>, window_params = [{transform_indices = @transform_0, window_bounds = array<i64: 16, 1320>}, {pipeline_mode = #tpu.pipeline_mode<synchronous>, transform_indices = @transform_1, window_bounds = array<i64: 1320, 256>}, {pipeline_mode = #tpu.pipeline_mode<synchronous>, transform_indices = @transform_2, window_bounds = array<i64: 1, 256>}, {pipeline_mode = #tpu.pipeline_mode<synchronous>, transform_indices = @transform_3, window_bounds = array<i64: 256, 256>}, {pipeline_mode = #tpu.pipeline_mode<synchronous>, transform_indices = @transform_4, window_bounds = array<i64: 1, 256>}, {pipeline_mode = #tpu.pipeline_mode<synchronous>, transform_indices = @transform_5, window_bounds = array<i64: 256, 256>}, {pipeline_mode = #tpu.pipeline_mode<synchronous>, transform_indices = @transform_6, window_bounds = array<i64: 1, 256>}, {pipeline_mode = #tpu.pipeline_mode<synchronous>, transform_indices = @transform_7, window_bounds = array<i64: 256, 128>}, {pipeline_mode = #tpu.pipeline_mode<synchronous>, transform_indices = @transform_8, window_bounds = array<i64: 1, 128>}, {transform_indices = @transform_9, window_bounds = array<i64: 16, 128>}]} {
    %c0 = arith.constant 0 : index
    %c0_0 = arith.constant 0 : index
    %0 = vector.load %arg1[%c0, %c0_0] : memref<16x1320xf32, #tpu.memory_space<vmem>>, vector<16x1320xf32>
    %1 = arith.truncf %0 : vector<16x1320xf32> to vector<16x1320xbf16>
    %c0_1 = arith.constant 0 : index
    %c0_2 = arith.constant 0 : index
    %2 = vector.load %arg2[%c0_1, %c0_2] : memref<1320x256xbf16, #tpu.memory_space<vmem>>, vector<1320x256xbf16>
    %cst = arith.constant dense<0.000000e+00> : vector<16x256xf32>
    %3 = tpu.matmul %1, %2, %cst {dimension_numbers = #tpu.dot_dimension_numbers<[1], [0], [0], [1], [0, 0, 1, 1], [], []>} : vector<16x1320xbf16>, vector<1320x256xbf16>, vector<16x256xf32> -> vector<16x256xf32>
    %c0_3 = arith.constant 0 : index
    %c0_4 = arith.constant 0 : index
    %4 = vector.load %arg3[%c0_3, %c0_4] : memref<1x256xf32, #tpu.memory_space<vmem>>, vector<1x256xf32>
    %5 = vector.broadcast %4 : vector<1x256xf32> to vector<16x256xf32>
    %6 = arith.addf %3, %5 : vector<16x256xf32>
    %cst_5 = arith.constant 0.000000e+00 : f32
    %7 = vector.broadcast %cst_5 : f32 to vector<16x256xf32>
    %8 = arith.cmpf ogt, %6, %7 : vector<16x256xf32>
    %cst_6 = arith.constant 0.00999999977 : f32
    %9 = vector.broadcast %cst_6 : f32 to vector<16x256xf32>
    %10 = arith.mulf %9, %6 : vector<16x256xf32>
    %11 = arith.select %8, %6, %10 : vector<16x256xi1>, vector<16x256xf32>
    %12 = arith.truncf %11 : vector<16x256xf32> to vector<16x256xbf16>
    %c0_7 = arith.constant 0 : index
    %c0_8 = arith.constant 0 : index
    %13 = vector.load %arg4[%c0_7, %c0_8] : memref<256x256xbf16, #tpu.memory_space<vmem>>, vector<256x256xbf16>
    %cst_9 = arith.constant dense<0.000000e+00> : vector<16x256xf32>
    %14 = tpu.matmul %12, %13, %cst_9 {dimension_numbers = #tpu.dot_dimension_numbers<[1], [0], [0], [1], [0, 0, 1, 1], [], []>} : vector<16x256xbf16>, vector<256x256xbf16>, vector<16x256xf32> -> vector<16x256xf32>
    %c0_10 = arith.constant 0 : index
    %c0_11 = arith.constant 0 : index
    %15 = vector.load %arg5[%c0_10, %c0_11] : memref<1x256xf32, #tpu.memory_space<vmem>>, vector<1x256xf32>
    %16 = vector.broadcast %15 : vector<1x256xf32> to vector<16x256xf32>
    %17 = arith.addf %14, %16 : vector<16x256xf32>
    %cst_12 = arith.constant 0.000000e+00 : f32
    %18 = vector.broadcast %cst_12 : f32 to vector<16x256xf32>
    %19 = arith.cmpf ogt, %17, %18 : vector<16x256xf32>
    %cst_13 = arith.constant 0.00999999977 : f32
    %20 = vector.broadcast %cst_13 : f32 to vector<16x256xf32>
    %21 = arith.mulf %20, %17 : vector<16x256xf32>
    %22 = arith.select %19, %17, %21 : vector<16x256xi1>, vector<16x256xf32>
    %23 = arith.truncf %22 : vector<16x256xf32> to vector<16x256xbf16>
    %c0_14 = arith.constant 0 : index
    %c0_15 = arith.constant 0 : index
    %24 = vector.load %arg6[%c0_14, %c0_15] : memref<256x256xbf16, #tpu.memory_space<vmem>>, vector<256x256xbf16>
    %cst_16 = arith.constant dense<0.000000e+00> : vector<16x256xf32>
    %25 = tpu.matmul %23, %24, %cst_16 {dimension_numbers = #tpu.dot_dimension_numbers<[1], [0], [0], [1], [0, 0, 1, 1], [], []>} : vector<16x256xbf16>, vector<256x256xbf16>, vector<16x256xf32> -> vector<16x256xf32>
    %c0_17 = arith.constant 0 : index
    %c0_18 = arith.constant 0 : index
    %26 = vector.load %arg7[%c0_17, %c0_18] : memref<1x256xf32, #tpu.memory_space<vmem>>, vector<1x256xf32>
    %27 = vector.broadcast %26 : vector<1x256xf32> to vector<16x256xf32>
    %28 = arith.addf %25, %27 : vector<16x256xf32>
    %cst_19 = arith.constant 0.000000e+00 : f32
    %29 = vector.broadcast %cst_19 : f32 to vector<16x256xf32>
    %30 = arith.cmpf ogt, %28, %29 : vector<16x256xf32>
    %cst_20 = arith.constant 0.00999999977 : f32
    %31 = vector.broadcast %cst_20 : f32 to vector<16x256xf32>
    %32 = arith.mulf %31, %28 : vector<16x256xf32>
    %33 = arith.select %30, %28, %32 : vector<16x256xi1>, vector<16x256xf32>
    %34 = arith.truncf %33 : vector<16x256xf32> to vector<16x256xbf16>
    %c0_21 = arith.constant 0 : index
    %c0_22 = arith.constant 0 : index
    %35 = vector.load %arg8[%c0_21, %c0_22] : memref<256x128xbf16, #tpu.memory_space<vmem>>, vector<256x128xbf16>
    %cst_23 = arith.constant dense<0.000000e+00> : vector<16x128xf32>
    %36 = tpu.matmul %34, %35, %cst_23 {dimension_numbers = #tpu.dot_dimension_numbers<[1], [0], [0], [1], [0, 0, 1, 1], [], []>} : vector<16x256xbf16>, vector<256x128xbf16>, vector<16x128xf32> -> vector<16x128xf32>
    %c0_24 = arith.constant 0 : index
    %c0_25 = arith.constant 0 : index
    %37 = vector.load %arg9[%c0_24, %c0_25] : memref<1x128xf32, #tpu.memory_space<vmem>>, vector<1x128xf32>
    %38 = vector.broadcast %37 : vector<1x128xf32> to vector<16x128xf32>
    %39 = arith.addf %36, %38 : vector<16x128xf32>
    %cst_26 = arith.constant 0.000000e+00 : f32
    %40 = vector.broadcast %cst_26 : f32 to vector<16x128xf32>
    %41 = arith.cmpf ogt, %39, %40 : vector<16x128xf32>
    %cst_27 = arith.constant 0.00999999977 : f32
    %42 = vector.broadcast %cst_27 : f32 to vector<16x128xf32>
    %43 = arith.mulf %42, %39 : vector<16x128xf32>
    %44 = arith.select %41, %39, %43 : vector<16x128xi1>, vector<16x128xf32>
    %45 = arith.truncf %44 : vector<16x128xf32> to vector<16x128xbf16>
    %c0_28 = arith.constant 0 : index
    %c0_29 = arith.constant 0 : index
    %46 = vector.load %arg10[%c0_28, %c0_29] : memref<16x128xbf16, #tpu.memory_space<vmem>>, vector<16x128xbf16>
    tpu.vector_store %arg10[%c0_28, %c0_29], %45 {strides = array<i32>} : memref<16x128xbf16, #tpu.memory_space<vmem>>, vector<16x128xbf16>,
    return
  }
  func.func @transform_0(%arg0: i32) -> (i32, i32) {
    %c0_i32 = arith.constant 0 : i32
    %c0_i32_0 = arith.constant 0 : i32
    return %arg0, %c0_i32 : i32, i32
  }
  func.func @transform_1(%arg0: i32) -> (i32, i32) {
    %c0_i32 = arith.constant 0 : i32
    %c0_i32_0 = arith.constant 0 : i32
    %c0_i32_1 = arith.constant 0 : i32
    return %c0_i32, %c0_i32_0 : i32, i32
  }
  func.func @transform_2(%arg0: i32) -> (i32, i32) {
    %c0_i32 = arith.constant 0 : i32
    %c0_i32_0 = arith.constant 0 : i32
    %c0_i32_1 = arith.constant 0 : i32
    return %c0_i32, %c0_i32_0 : i32, i32
  }
  func.func @transform_3(%arg0: i32) -> (i32, i32) {
    %c0_i32 = arith.constant 0 : i32
    %c0_i32_0 = arith.constant 0 : i32
    %c0_i32_1 = arith.constant 0 : i32
    return %c0_i32, %c0_i32_0 : i32, i32
  }
  func.func @transform_4(%arg0: i32) -> (i32, i32) {
    %c0_i32 = arith.constant 0 : i32
    %c0_i32_0 = arith.constant 0 : i32
    %c0_i32_1 = arith.constant 0 : i32
    return %c0_i32, %c0_i32_0 : i32, i32
  }
  func.func @transform_5(%arg0: i32) -> (i32, i32) {
    %c0_i32 = arith.constant 0 : i32
    %c0_i32_0 = arith.constant 0 : i32
    %c0_i32_1 = arith.constant 0 : i32
    return %c0_i32, %c0_i32_0 : i32, i32
  }
  func.func @transform_6(%arg0: i32) -> (i32, i32) {
    %c0_i32 = arith.constant 0 : i32
    %c0_i32_0 = arith.constant 0 : i32
    %c0_i32_1 = arith.constant 0 : i32
    return %c0_i32, %c0_i32_0 : i32, i32
  }
  func.func @transform_7(%arg0: i32) -> (i32, i32) {
    %c0_i32 = arith.constant 0 : i32
    %c0_i32_0 = arith.constant 0 : i32
    %c0_i32_1 = arith.constant 0 : i32
    return %c0_i32, %c0_i32_0 : i32, i32
  }
  func.func @transform_8(%arg0: i32) -> (i32, i32) {
    %c0_i32 = arith.constant 0 : i32
    %c0_i32_0 = arith.constant 0 : i32
    %c0_i32_1 = arith.constant 0 : i32
    return %c0_i32, %c0_i32_0 : i32, i32
  }
  func.func @transform_9(%arg0: i32) -> (i32, i32) {
    %c0_i32 = arith.constant 0 : i32
    %c0_i32_0 = arith.constant 0 : i32
    return %arg0, %c0_i32 : i32, i32
  }
}

</mosaic_0001>

<bundles_post_ra>
// kernel: tpu_custom_call.1
= control target key start
LH: loop header
LB: loop body
LE: loop exit
PB: predicated region body
PF: predicated region fallthrough
CT: control target
= control target key end

     0   :  { %14 = vsyncpa [#allocation3], 0  ;;  %s3799_s0 = inlined_call_operand.hbm [shape: f32[16,1320], index: 0, kind: input, shape index: {}]   ;;  %s3800_s1 = inlined_call_operand.hbm [shape: bf16[1320,256], index: 1, kind: input, shape index: {}]   ;;  %s3801_s2 = inlined_call_operand.hbm [shape: f32[1,256], index: 2, kind: input, shape index: {}]   ;;  %s3802_s3 = inlined_call_operand.hbm [shape: bf16[256,256], index: 3, kind: input, shape index: {}]   ;;  %s3803_s4 = inlined_call_operand.vmem [shape: f32[1,256], index: 4, kind: input, shape index: {}]   ;;  %s3804_s5 = inlined_call_operand.hbm [shape: bf16[256,256], index: 5, kind: input, shape index: {}]   ;;  %s3805_s6 = inlined_call_operand.vmem [shape: f32[1,256], index: 6, kind: input, shape index: {}]   ;;  %s3806_s7 = inlined_call_operand.hbm [shape: bf16[256,128], index: 7, kind: input, shape index: {}]   ;;  %s3807_s8 = inlined_call_operand.vmem [shape: f32[1,128], index: 8, kind: input, shape index: {}]   ;;  %s3808_s9 = inlined_call_operand.hbm [shape: bf16[16,128], index: 9, kind: output, shape index: {}]  }
   0x1   :  { %15 = vsyncpa [#allocation6], 0 }
   0x2   :  { %16 = vsyncpa [#allocation9], 0 }
   0x3   :  { %17 = vsyncpa [#allocation12], 0  ;;  %s36_s11 = sshll.u32 %s3800_s1, 4  ;;  %s37_s11 = int_to_ptr.hbm [resolvable:$true] %s36_s11 }
   0x4   :  { %18 = vsyncpa [#allocation4], 0  ;;  %s3635_s12 = smov [#allocation5]   ;;  %s60_s16 = sshll.u32 %s3802_s3, 4  ;;  %s61_s16 = int_to_ptr.hbm [resolvable:$true] %s60_s16 }
   0x5   :  { %s38_s13 = sshll.u32 %s3635_s12, 4  ;;  %s3636_s17 = smov 128   ;;  %s39_s13 = int_to_ptr.vmem [resolvable:$true] %s38_s13 }
   0x6   :  { %s3637_s18 = smov 8   ;;  %s3638_s19 = smov [#allocation8]  }
   0x7   :  { %44 = dma.hbm_to_vmem [thread:$0]  %s37_s11, 21120, %s39_s13, [#allocation6], %s3636_s17, %s3636_s17, %s3637_s18  }
   0x8   :  { %s62_s20 = sshll.u32 %s3638_s19, 4  ;;  %s23_s22 = sshll.u32 %s3799_s0, 4  ;;  %s63_s20 = int_to_ptr.vmem [resolvable:$true] %s62_s20  ;;  %s24_s22 = int_to_ptr.hbm [resolvable:$true] %s23_s22 }
   0x9   :  { %68 = dma.hbm_to_vmem [thread:$0]  %s61_s16, 4096, %s63_s20, [#allocation9], %s3636_s17, %s3636_s17, %s3637_s18  }
   0xa   :  { %s3639_s3 = smov [#allocation2]   ;;  %s50_s26 = sshll.u32 %s3801_s2, 4  ;;  %s51_s26 = int_to_ptr.hbm [resolvable:$true] %s50_s26 }
   0xb   :  { %s25_s23 = sshll.u32 %s3639_s3, 4  ;;  %s3640_s27 = smov 1408   ;;  %s26_s23 = int_to_ptr.vmem [resolvable:$true] %s25_s23 }
   0xc   :  { %s3641_s28 = smov 88   ;;  %s3642_s29 = smov [#allocation7]  }
   0xd   :  { %31 = dma.hbm_to_vmem [thread:$0]  %s24_s22, 2816, %s26_s23, [#allocation3], %s3640_s27, %s3640_s27, %s3641_s28  }
   0xe   :  { %s52_s30 = sshll.u32 %s3642_s29, 4  ;;  %s75_s11 = sshll.u32 %s3804_s5, 4  ;;  %s53_s30 = int_to_ptr.vmem [resolvable:$true] %s52_s30  ;;  %s76_s11 = int_to_ptr.hbm [resolvable:$true] %s75_s11 }
   0xf   :  { %55 = dma.hbm_to_vmem [thread:$0]  %s51_s26, 32, %s53_s30, [#allocation6]  }
  0x10   :  { %s90_s14 = sshll.u32 %s3806_s7, 4  ;;  %s3643_s15 = smov [#allocation10]   ;;  %s91_s14 = int_to_ptr.hbm [resolvable:$true] %s90_s14 }
  0x11   :  { %s77_s16 = sshll.u32 %s3643_s15, 4  ;;  %s3644_s2 = smov [#allocation11]   ;;  %s78_s16 = int_to_ptr.vmem [resolvable:$true] %s77_s16 }
  0x12   :  { %83 = dma.hbm_to_vmem [thread:$0]  %s76_s11, 4096, %s78_s16, [#allocation9], %s3636_s17, %s3636_s17, %s3637_s18  }
  0x13   :  { %s92_s19 = sshll.u32 %s3644_s2, 4  ;;  %s3645_s20 = smov 64   ;;  %s93_s19 = int_to_ptr.vmem [resolvable:$true] %s92_s19 }
  0x14   :  { %s3646_s5 = smov 4  }
  0x15   :  { %98 = dma.hbm_to_vmem [thread:$0]  %s91_s14, 2048, %s93_s19, [#allocation12], %s3645_s20, %s3645_s20, %s3646_s5  }
  0x16   :  { %3625 = dma.done.wait [#allocation3], 2816  }
  0x17   :  { %3626 = vsyncadd [#allocation3], 4294964480 }
  0x18   :  { %3627 = dma.done.wait [#allocation6], 21152  }
  0x19   :  { %3628 = vsyncadd [#allocation6], 4294946144 }
  0x1a   :  { %3629 = dma.done.wait [#allocation9], 8192  }
  0x1b   :  { %3630 = vsyncadd [#allocation9], 4294959104 }
  0x1c   :  { %3631 = dma.done.wait [#allocation12], 2048  }
  0x1d   :  { %3632 = vsyncadd [#allocation12], 4294965248  ;;  %v2274_v0 = vld [vmem:[#allocation5 + $0x70] sm:$0xf]  ;;  %v3209_v1 = vld [vmem:[#allocation5 + $0x74] sm:$0xf0] }
  0x1e   :  { %v2402_v2 = vld [vmem:[#allocation5 + $0x170] sm:$0xf]  ;;  %v2275_v3 = vor.u32 %v3209_v1, %v2274_v0  ;;  %v3241_v4 = vld [vmem:[#allocation5 + $0x174] sm:$0xf0]  ;;  %v2266_v11 = vld [vmem:[#allocation5 + $0x60] sm:$0xf] }
  0x1f   :  { %v2466_v5 = vld [vmem:[#allocation5 + $0x1f0] sm:$0xf]  ;;  %v3257_v6 = vld [vmem:[#allocation5 + $0x1f4] sm:$0xf0]  ;;  %v2403_v7 = vor.u32 %v3241_v4, %v2402_v2  ;;  %v3207_v13 = vld [vmem:[#allocation5 + $0x64] sm:$0xf0] }
  0x20   :  { %v2467_v8 = vor.u32 %v3257_v6, %v2466_v5  ;;  %v2338_v9 = vld [vmem:[#allocation5 + $0xf0] sm:$0xf]  ;;  %v3225_v10 = vld [vmem:[#allocation5 + $0xf4] sm:$0xf0]  ;;  %1166 = vmatpush.bf16.msra.mxu0 %v2275_v3  ;;  %v2394_v14 = vld [vmem:[#allocation5 + $0x160] sm:$0xf]  ;;  %v2267_v16 = vor.u32 %v3207_v13, %v2266_v11 }
  0x21   :  { %v2339_v12 = vor.u32 %v3225_v10, %v2338_v9  ;;  %v3239_v15 = vld [vmem:[#allocation5 + $0x164] sm:$0xf0]  ;;  %1194 = vmatpush.bf16.msra.mxu2 %v2403_v7  ;;  %v2458_v18 = vld [vmem:[#allocation5 + $0x1e0] sm:$0xf]  ;;  %v2258_v23 = vld [vmem:[#allocation5 + $0x50] sm:$0xf] }
  0x22   :  { %1208 = vmatpush.bf16.msra.mxu3 %v2467_v8  ;;  %v2395_v17 = vor.u32 %v3239_v15, %v2394_v14  ;;  %v3255_v19 = vld [vmem:[#allocation5 + $0x1e4] sm:$0xf0]  ;;  %v2330_v20 = vld [vmem:[#allocation5 + $0xe0] sm:$0xf]  ;;  %v3205_v24 = vld [vmem:[#allocation5 + $0x54] sm:$0xf0] }
  0x23   :  { %1180 = vmatpush.bf16.msra.mxu1 %v2339_v12  ;;  %v2459_v21 = vor.u32 %v3255_v19, %v2458_v18  ;;  %v3223_v22 = vld [vmem:[#allocation5 + $0xe4] sm:$0xf0]  ;;  %v2386_v26 = vld [vmem:[#allocation5 + $0x150] sm:$0xf]  ;;  %v3237_v27 = vld [vmem:[#allocation5 + $0x154] sm:$0xf0]  ;;  %v2259_v29 = vor.u32 %v3205_v24, %v2258_v23 }
  0x24   :  { %v2331_v25 = vor.u32 %v3223_v22, %v2330_v20  ;;  %v2450_v28 = vld [vmem:[#allocation5 + $0x1d0] sm:$0xf]  ;;  %1167 = vmatpush.bf16.msra.mxu0 %v2267_v16  ;;  %v3253_v30 = vld [vmem:[#allocation5 + $0x1d4] sm:$0xf0]  ;;  %v2387_v33 = vor.u32 %v3237_v27, %v2386_v26  ;;  %v2250_v35 = vld [vmem:[#allocation5 + $0x40] sm:$0xf] }
  0x25   :  { %v2322_v31 = vld [vmem:[#allocation5 + $0xd0] sm:$0xf]  ;;  %v3221_v32 = vld [vmem:[#allocation5 + $0xd4] sm:$0xf0]  ;;  %1195 = vmatpush.bf16.msra.mxu2 %v2395_v17  ;;  %v2451_v34 = vor.u32 %v3253_v30, %v2450_v28  ;;  %v3203_v36 = vld [vmem:[#allocation5 + $0x44] sm:$0xf0] }
  0x26   :  { %1209 = vmatpush.bf16.msra.mxu3 %v2459_v21  ;;  %v2378_v37 = vld [vmem:[#allocation5 + $0x140] sm:$0xf]  ;;  %v2323_v38 = vor.u32 %v3221_v32, %v2322_v31  ;;  %v3235_v39 = vld [vmem:[#allocation5 + $0x144] sm:$0xf0]  ;;  %v2251_v44 = vor.u32 %v3203_v36, %v2250_v35  ;;  %v2242_v47 = vld [vmem:[#allocation5 + $0x30] sm:$0xf] }
  0x27   :  { %1181 = vmatpush.bf16.msra.mxu1 %v2331_v25  ;;  %v2442_v40 = vld [vmem:[#allocation5 + $0x1c0] sm:$0xf]  ;;  %v3251_v41 = vld [vmem:[#allocation5 + $0x1c4] sm:$0xf0]  ;;  %v2379_v45 = vor.u32 %v3235_v39, %v2378_v37  ;;  %v3201_v48 = vld [vmem:[#allocation5 + $0x34] sm:$0xf0] }
  0x28   :  { %v2314_v42 = vld [vmem:[#allocation5 + $0xc0] sm:$0xf]  ;;  %v3219_v43 = vld [vmem:[#allocation5 + $0xc4] sm:$0xf0]  ;;  %1168 = vmatpush.bf16.msra.mxu0 %v2259_v29  ;;  %v2443_v46 = vor.u32 %v3251_v41, %v2442_v40  ;;  %v2370_v49 = vld [vmem:[#allocation5 + $0x130] sm:$0xf]  ;;  %v2243_v56 = vor.u32 %v3201_v48, %v2242_v47 }
  0x29   :  { %1196 = vmatpush.bf16.msra.mxu2 %v2387_v33  ;;  %v2315_v50 = vor.u32 %v3219_v43, %v2314_v42  ;;  %v3233_v51 = vld [vmem:[#allocation5 + $0x134] sm:$0xf0]  ;;  %v2434_v52 = vld [vmem:[#allocation5 + $0x1b0] sm:$0xf]  ;;  %v2234_v59 = vld [vmem:[#allocation5 + $0x20] sm:$0xf] }
  0x2a   :  { %1210 = vmatpush.bf16.msra.mxu3 %v2451_v34  ;;  %v3249_v53 = vld [vmem:[#allocation5 + $0x1b4] sm:$0xf0]  ;;  %v2306_v54 = vld [vmem:[#allocation5 + $0xb0] sm:$0xf]  ;;  %v2371_v57 = vor.u32 %v3233_v51, %v2370_v49  ;;  %v3199_v60 = vld [vmem:[#allocation5 + $0x24] sm:$0xf0] }
  0x2b   :  { %1182 = vmatpush.bf16.msra.mxu1 %v2323_v38  ;;  %v3217_v55 = vld [vmem:[#allocation5 + $0xb4] sm:$0xf0]  ;;  %v2435_v58 = vor.u32 %v3249_v53, %v2434_v52  ;;  %v2362_v61 = vld [vmem:[#allocation5 + $0x120] sm:$0xf]  ;;  %v3231_v63 = vld [vmem:[#allocation5 + $0x124] sm:$0xf0]  ;;  %v2235_v4 = vor.u32 %v3199_v60, %v2234_v59 }
  0x2c   :  { %1169 = vmatpush.bf16.msra.mxu0 %v2251_v44  ;;  %v2307_v62 = vor.u32 %v3217_v55, %v2306_v54  ;;  %v2426_v0 = vld [vmem:[#allocation5 + $0x1a0] sm:$0xf]  ;;  %v3247_v1 = vld [vmem:[#allocation5 + $0x1a4] sm:$0xf0]  ;;  %v2363_v5 = vor.u32 %v3231_v63, %v2362_v61  ;;  %v2226_v7 = vld [vmem:[#allocation5 + $0x10] sm:$0xf] }
  0x2d   :  { %1197 = vmatpush.bf16.msra.mxu2 %v2379_v45  ;;  %v2298_v2 = vld [vmem:[#allocation5 + $0xa0] sm:$0xf]  ;;  %v3215_v3 = vld [vmem:[#allocation5 + $0xa4] sm:$0xf0]  ;;  %v2427_v6 = vor.u32 %v3247_v1, %v2426_v0  ;;  %v3197_v8 = vld [vmem:[#allocation5 + $0x14] sm:$0xf0] }
  0x2e   :  { %1211 = vmatpush.bf16.msra.mxu3 %v2443_v46  ;;  %v2354_v9 = vld [vmem:[#allocation5 + $0x110] sm:$0xf]  ;;  %v2299_v10 = vor.u32 %v3215_v3, %v2298_v2  ;;  %v3229_v11 = vld [vmem:[#allocation5 + $0x114] sm:$0xf0]  ;;  %v2227_v16 = vor.u32 %v3197_v8, %v2226_v7  ;;  %v2218_v17 = vld [vmem:[#allocation5] sm:$0xf] }
  0x2f   :  { %1183 = vmatpush.bf16.msra.mxu1 %v2315_v50  ;;  %v2418_v12 = vld [vmem:[#allocation5 + $0x190] sm:$0xf]  ;;  %v3245_v13 = vld [vmem:[#allocation5 + $0x194] sm:$0xf0]  ;;  %v3195_v18 = vld [vmem:[#allocation5 + $0x4] sm:$0xf0]  ;;  %v2355_v19 = vor.u32 %v3229_v11, %v2354_v9 }
  0x30   :  { %1170 = vmatpush.bf16.msra.mxu0 %v2243_v56  ;;  %v2290_v14 = vld [vmem:[#allocation5 + $0x90] sm:$0xf]  ;;  %v3213_v15 = vld [vmem:[#allocation5 + $0x94] sm:$0xf0]  ;;  %v2419_v20 = vor.u32 %v3245_v13, %v2418_v12  ;;  %v2346_v21 = vld [vmem:[#allocation5 + $0x100] sm:$0xf]  ;;  %v2219_v31 = vor.u32 %v3195_v18, %v2218_v17 }
  0x31   :  { %1198 = vmatpush.bf16.msra.mxu2 %v2371_v57  ;;  %v3227_v22 = vld [vmem:[#allocation5 + $0x104] sm:$0xf0]  ;;  %v2410_v23 = vld [vmem:[#allocation5 + $0x180] sm:$0xf]  ;;  %v2291_v24 = vor.u32 %v3213_v15, %v2290_v14  ;;  %v2530_v26 = vld [vmem:[#allocation5 + $0x270] sm:$0xf] }
  0x32   :  { %1212 = vmatpush.bf16.msra.mxu3 %v2435_v58  ;;  %v3243_v25 = vld [vmem:[#allocation5 + $0x184] sm:$0xf0]  ;;  %v3273_v27 = vld [vmem:[#allocation5 + $0x274] sm:$0xf0]  ;;  %v2658_v28 = vld [vmem:[#allocation5 + $0x370] sm:$0xf]  ;;  %v2347_v35 = vor.u32 %v3227_v22, %v2346_v21 }
  0x33   :  { %1184 = vmatpush.bf16.msra.mxu1 %v2307_v62  ;;  %v3305_v29 = vld [vmem:[#allocation5 + $0x374] sm:$0xf0]  ;;  %v2722_v30 = vld [vmem:[#allocation5 + $0x3f0] sm:$0xf]  ;;  %v2282_v33 = vld [vmem:[#allocation5 + $0x80] sm:$0xf]  ;;  %v2411_v36 = vor.u32 %v3243_v25, %v2410_v23  ;;  %v2531_v39 = vor.u32 %v3273_v27, %v2530_v26 }
  0x34   :  { %1171 = vmatpush.bf16.msra.mxu0 %v2235_v4  ;;  %v3321_v32 = vld [vmem:[#allocation5 + $0x3f4] sm:$0xf0]  ;;  %v3211_v34 = vld [vmem:[#allocation5 + $0x84] sm:$0xf0]  ;;  %v2594_v37 = vld [vmem:[#allocation5 + $0x2f0] sm:$0xf]  ;;  %v2659_v40 = vor.u32 %v3305_v29, %v2658_v28 }
  0x35   :  { %1199 = vmatpush.bf16.msra.mxu2 %v2363_v5  ;;  %v3289_v38 = vld [vmem:[#allocation5 + $0x2f4] sm:$0xf0]  ;;  %v2522_v41 = vld [vmem:[#allocation5 + $0x260] sm:$0xf]  ;;  %v3271_v42 = vld [vmem:[#allocation5 + $0x264] sm:$0xf0]  ;;  %v2723_v44 = vor.u32 %v3321_v32, %v2722_v30  ;;  %v2283_v45 = vor.u32 %v3211_v34, %v2282_v33 }
  0x36   :  { %1213 = vmatpush.bf16.msra.mxu3 %v2427_v6  ;;  %v2650_v43 = vld [vmem:[#allocation5 + $0x360] sm:$0xf]  ;;  %v3303_v46 = vld [vmem:[#allocation5 + $0x364] sm:$0xf0]  ;;  %v2595_v49 = vor.u32 %v3289_v38, %v2594_v37  ;;  %v139_v52 = vld [vmem:[#allocation2 + $0x68] sm:$0xff]  ;;  %v2523_v57 = vor.u32 %v3271_v42, %v2522_v41  ;;  %vm1159_vm0 = vcmask 1043456  }
  0x37   :  { %1185 = vmatpush.bf16.msra.mxu1 %v2299_v10  ;;  %v2714_v47 = vld [vmem:[#allocation5 + $0x3e0] sm:$0xf]  ;;  %v3319_v48 = vld [vmem:[#allocation5 + $0x3e4] sm:$0xf0]  ;;  %v2514_v54 = vld [vmem:[#allocation5 + $0x250] sm:$0xf]  ;;  %v2651_v58 = vor.u32 %v3303_v46, %v2650_v43 }
  0x38   :  { %1172 = vmatpush.bf16.msra.mxu0 %v2227_v16  ;;  %v2586_v50 = vld [vmem:[#allocation5 + $0x2e0] sm:$0xf]  ;;  %v3287_v53 = vld [vmem:[#allocation5 + $0x2e4] sm:$0xf0]  ;;  %v126_v56 = vld [vmem:[#allocation2] sm:$0xff]  ;;  %v2715_v62 = vor.u32 %v3319_v48, %v2714_v47  ;;  %vm1155_vm1 = vcmask 326656  }
  0x39   :  { %1200 = vmatpush.bf16.msra.mxu2 %v2355_v19  ;;  %v128_v51 = vld [vmem:[#allocation2 + $0x10] sm:$0xff]  ;;  %v137_v59 = vld [vmem:[#allocation2 + $0x58] sm:$0xff]  ;;  %v3269_v63 = vld [vmem:[#allocation5 + $0x254] sm:$0xf0]  ;;  %v2587_v4 = vor.u32 %v3287_v53, %v2586_v50  ;;  %s3647_s1 = smov [#allocation13]   ;;  %s2200_s24 = sshll.u32 %s3808_s9, 4  ;;  %s2201_s24 = int_to_ptr.hbm [resolvable:$true] %s2200_s24 }
  0x3a   :  { %1214 = vmatpush.bf16.msra.mxu3 %v2419_v20  ;;  %v3728_v55 = vpack.c.bf16 %v139_v52, %v128_v51  ;;  %v129_v60 = vld [vmem:[#allocation2 + $0x18] sm:$0xff]  ;;  %v140_v61 = vld [vmem:[#allocation2 + $0x70] sm:$0xff]  ;;  %v2642_v0 = vld [vmem:[#allocation5 + $0x350] sm:$0xf]  ;;  %v3730_v2 = vpack.c.bf16 %v137_v59, %v126_v56  ;;  %v2515_v11 = vor.u32 %v3269_v63, %v2514_v54  ;;  %s2198_s22 = sshll.u32 %s3647_s1, 4  ;;  %s2199_s22 = int_to_ptr.vmem [resolvable:$true] %s2198_s22 }
  0x3b   :  { %1186 = vmatpush.bf16.msra.mxu1 %v2291_v24  ;;  %v3301_v1 = vld [vmem:[#allocation5 + $0x354] sm:$0xf0]  ;;  %v3732_v3 = vpack.c.bf16 %v140_v61, %v129_v60  ;;  %v2706_v5 = vld [vmem:[#allocation5 + $0x3d0] sm:$0xf]  ;;  %v2506_v13 = vld [vmem:[#allocation5 + $0x240] sm:$0xf] }
  0x3c   :  { %1173 = vmatpush.bf16.msra.mxu0 %v2219_v31  ;;  %v3317_v6 = vld [vmem:[#allocation5 + $0x3d4] sm:$0xf0]  ;;  %v2578_v7 = vld [vmem:[#allocation5 + $0x2d0] sm:$0xf]  ;;  %v2643_v12 = vor.u32 %v3301_v1, %v2642_v0  ;;  %v3267_v16 = vld [vmem:[#allocation5 + $0x244] sm:$0xf0] }
  0x3d   :  { %1201 = vmatpush.bf16.msra.mxu2 %v2347_v35  ;;  %v3285_v8 = vld [vmem:[#allocation5 + $0x2d4] sm:$0xf0]  ;;  %v138_v10 = vld [vmem:[#allocation2 + $0x60] sm:$0xff]  ;;  %v2707_v15 = vor.u32 %v3317_v6, %v2706_v5  ;;  %v2634_v17 = vld [vmem:[#allocation5 + $0x340] sm:$0xf]  ;;  %v2507_v24 = vor.u32 %v3267_v16, %v2506_v13 }
  0x3e   :  { %1215 = vmatpush.bf16.msra.mxu3 %v2411_v36  ;;  %v127_v9 = vld [vmem:[#allocation2 + $0x8] sm:$0xff]  ;;  %v3299_v18 = vld [vmem:[#allocation5 + $0x344] sm:$0xf0]  ;;  %v2579_v19 = vor.u32 %v3285_v8, %v2578_v7  ;;  %v2698_v20 = vld [vmem:[#allocation5 + $0x3c0] sm:$0xf] }
  0x3f   :  { %1187 = vmatpush.bf16.msra.mxu1 %v2283_v45  ;;  %1174 = vmatmul.bf16.vlgmr.msra.gmra.mxu0 %v3730_v2  ;;  %v3737_v14 = vpack.c.bf16 %v138_v10, %v127_v9  ;;  %v3315_v21 = vld [vmem:[#allocation5 + $0x3c4] sm:$0xf0]  ;;  %v2570_v22 = vld [vmem:[#allocation5 + $0x2c0] sm:$0xf]  ;;  %v2635_v25 = vor.u32 %v3299_v18, %v2634_v17  ;;  %v2498_v26 = vld [vmem:[#allocation5 + $0x230] sm:$0xf] }
  0x40   :  { %1222 = vmatpush.bf16.msrb.mxu0 %v2531_v39  ;;  %1202 = vmatmul.bf16.vlgmr.msra.gmra.mxu2 %v3728_v55  ;;  %v3283_v23 = vld [vmem:[#allocation5 + $0x2c4] sm:$0xf0]  ;;  %v2699_v27 = vor.u32 %v3315_v21, %v2698_v20  ;;  %v3265_v28 = vld [vmem:[#allocation5 + $0x234] sm:$0xf0]  ;;  %v2626_v29 = vld [vmem:[#allocation5 + $0x330] sm:$0xf] }
  0x41   :  { %1250 = vmatpush.bf16.msrb.mxu2 %v2659_v40  ;;  %1216 = vmatmul.bf16.vlgmr.msra.gmra.mxu3 %v3732_v3  ;;  %v3297_v30 = vld [vmem:[#allocation5 + $0x334] sm:$0xf0]  ;;  %v2571_v31 = vor.u32 %v3283_v23, %v2570_v22  ;;  %v2690_v32 = vld [vmem:[#allocation5 + $0x3b0] sm:$0xf]  ;;  %v2499_v36 = vor.u32 %v3265_v28, %v2498_v26  ;;  %v2490_v38 = vld [vmem:[#allocation5 + $0x220] sm:$0xf] }
  0x42   :  { %1264 = vmatpush.bf16.msrb.mxu3 %v2723_v44  ;;  %1188 = vmatmul.bf16.vlgmr.msra.gmra.mxu1 %v3737_v14  ;;  %v3313_v33 = vld [vmem:[#allocation5 + $0x3b4] sm:$0xf0]  ;;  %v2562_v34 = vld [vmem:[#allocation5 + $0x2b0] sm:$0xf]  ;;  %v2627_v37 = vor.u32 %v3297_v30, %v2626_v29  ;;  %v3263_v40 = vld [vmem:[#allocation5 + $0x224] sm:$0xf0] }
  0x43   :  { %1236 = vmatpush.bf16.msrb.mxu1 %v2595_v49  ;;  %v3281_v35 = vld [vmem:[#allocation5 + $0x2b4] sm:$0xf0]  ;;  %v2691_v39 = vor.u32 %v3313_v33, %v2690_v32  ;;  %v2618_v41 = vld [vmem:[#allocation5 + $0x320] sm:$0xf]  ;;  %v3295_v42 = vld [vmem:[#allocation5 + $0x324] sm:$0xf0]  ;;  %v2491_v48 = vor.u32 %v3263_v40, %v2490_v38 }
  0x44   :  { %1223 = vmatpush.bf16.msrb.mxu0 %v2523_v57  ;;  %v2563_v43 = vor.u32 %v3281_v35, %v2562_v34  ;;  %v2682_v44 = vld [vmem:[#allocation5 + $0x3a0] sm:$0xf]  ;;  %v3311_v45 = vld [vmem:[#allocation5 + $0x3a4] sm:$0xf0]  ;;  %v2619_v49 = vor.u32 %v3295_v42, %v2618_v41  ;;  %v2482_v50 = vld [vmem:[#allocation5 + $0x210] sm:$0xf] }
  0x45   :  { %1251 = vmatpush.bf16.msrb.mxu2 %v2651_v58  ;;  %v2554_v46 = vld [vmem:[#allocation5 + $0x2a0] sm:$0xf]  ;;  %v3279_v47 = vld [vmem:[#allocation5 + $0x2a4] sm:$0xf0]  ;;  %v2683_v52 = vor.u32 %v3311_v45, %v2682_v44  ;;  %v3261_v53 = vld [vmem:[#allocation5 + $0x214] sm:$0xf0] }
  0x46   :  { %1265 = vmatpush.bf16.msrb.mxu3 %v2715_v62  ;;  %v3740_v51 = vld [vmem:[#allocation5 + $0x520] sm:$0xff]  ;;  %v2610_v54 = vld [vmem:[#allocation5 + $0x310] sm:$0xf]  ;;  %v3293_v56 = vld [vmem:[#allocation5 + $0x314] sm:$0xf0]  ;;  %v2555_v57 = vor.u32 %v3279_v47, %v2554_v46  ;;  %v2483_v1 = vor.u32 %v3261_v53, %v2482_v50 }
  0x47   :  { %1237 = vmatpush.bf16.msrb.mxu1 %v2587_v4  ;;  %v2674_v58 = vld [vmem:[#allocation5 + $0x390] sm:$0xf]  ;;  %v3309_v59 = vld [vmem:[#allocation5 + $0x394] sm:$0xf0]  ;;  %v2474_v62 = vld [vmem:[#allocation5 + $0x200] sm:$0xf]  ;;  %v823_v0 = vunpack.c.l.b16 %v3740_v51  ;;  %v2611_v4 = vor.u32 %v3293_v56, %v2610_v54 }
  0x48   :  { %1224 = vmatpush.bf16.msrb.mxu0 %v2515_v11  ;;  %v2546_v60 = vld [vmem:[#allocation5 + $0x290] sm:$0xf]  ;;  %v3277_v61 = vld [vmem:[#allocation5 + $0x294] sm:$0xf0]  ;;  %v3259_v63 = vld [vmem:[#allocation5 + $0x204] sm:$0xf0]  ;;  %v2675_v8 = vor.u32 %v3309_v59, %v2674_v58 }
  0x49   :  { %1252 = vmatpush.bf16.msrb.mxu2 %v2643_v12  ;;  %v2602_v5 = vld [vmem:[#allocation5 + $0x300] sm:$0xf]  ;;  %v3291_v6 = vld [vmem:[#allocation5 + $0x304] sm:$0xf0]  ;;  %v2786_v10 = vld [vmem:[#allocation5 + $0x470] sm:$0xf]  ;;  %v2547_v12 = vor.u32 %v3277_v61, %v2546_v60  ;;  %v989_v17 = vpack.c.b16 %v823_v0, %v823_v0  ;;  %v2475_v21 = vor.u32 %v3259_v63, %v2474_v62 }
  0x4a   :  { %1266 = vmatpush.bf16.msrb.mxu3 %v2707_v15  ;;  %v2666_v7 = vld [vmem:[#allocation5 + $0x380] sm:$0xf]  ;;  %v3307_v9 = vld [vmem:[#allocation5 + $0x384] sm:$0xf0]  ;;  %v3337_v11 = vld [vmem:[#allocation5 + $0x474] sm:$0xf0]  ;;  %v2603_v22 = vor.u32 %v3291_v6, %v2602_v5 }
  0x4b   :  { %1238 = vmatpush.bf16.msrb.mxu1 %v2579_v19  ;;  %v3208_v13 = vld [vmem:[#allocation5 + $0x74] sm:$0xf]  ;;  %v2276_v15 = vld [vmem:[#allocation5 + $0x78] sm:$0xf0]  ;;  %v2538_v16 = vld [vmem:[#allocation5 + $0x280] sm:$0xf]  ;;  %v2667_v26 = vor.u32 %v3307_v9, %v2666_v7 }
  0x4c   :  { %1225 = vmatpush.bf16.msrb.mxu0 %v2507_v24  ;;  %v3275_v18 = vld [vmem:[#allocation5 + $0x284] sm:$0xf0]  ;;  %v130_v19 = vld [vmem:[#allocation2 + $0x20] sm:$0xff]  ;;  %v132_v23 = vld [vmem:[#allocation2 + $0x30] sm:$0xff]  ;;  %v1161_v35 = vsel %vm1159_vm0, %v989_v17, 0 }
  0x4d   :  { %1253 = vmatpush.bf16.msrb.mxu2 %v2635_v25  ;;  %v141_v20 = vld [vmem:[#allocation2 + $0x78] sm:$0xff]  ;;  %v143_v24 = vld [vmem:[#allocation2 + $0x88] sm:$0xff]  ;;  %v2850_v25 = vld [vmem:[#allocation5 + $0x4f0] sm:$0xf] }
  0x4e   :  { %1267 = vmatpush.bf16.msrb.mxu3 %v2699_v27  ;;  %v2787_v27 = vor.u32 %v3337_v11, %v2786_v10  ;;  %v3353_v28 = vld [vmem:[#allocation5 + $0x4f4] sm:$0xf0]  ;;  %v133_v30 = vld [vmem:[#allocation2 + $0x38] sm:$0xff]  ;;  %v144_v32 = vld [vmem:[#allocation2 + $0x90] sm:$0xff]  ;;  %v3746_v41 = vpack.c.bf16 %v143_v24, %v132_v23 }
  0x4f   :  { %1239 = vmatpush.bf16.msrb.mxu1 %v2571_v31  ;;  %v131_v29 = vld [vmem:[#allocation2 + $0x28] sm:$0xff]  ;;  %v2279_v31 = vor.u32 %v3208_v13, %v2276_v15  ;;  %v2778_v33 = vld [vmem:[#allocation5 + $0x460] sm:$0xf]  ;;  %v3335_v34 = vld [vmem:[#allocation5 + $0x464] sm:$0xf0]  ;;  %v2851_v42 = vor.u32 %v3353_v28, %v2850_v25  ;;  %v3748_v45 = vpack.c.bf16 %v144_v32, %v133_v30 }
  0x50   :  { %1226 = vmatpush.bf16.msrb.mxu0 %v2499_v36  ;;  %v2539_v36 = vor.u32 %v3275_v18, %v2538_v16  ;;  %v142_v38 = vld [vmem:[#allocation2 + $0x80] sm:$0xff]  ;;  %v3357_v40 = vld [vmem:[#allocation5 + $0x514] sm:$0xf0]  ;;  %v2268_v44 = vld [vmem:[#allocation5 + $0x68] sm:$0xf0]  ;;  %v2779_v46 = vor.u32 %v3335_v34, %v2778_v33 }
  0x51   :  { %1254 = vmatpush.bf16.msrb.mxu2 %v2627_v37  ;;  %v3744_v37 = vpack.c.bf16 %v141_v20, %v130_v19  ;;  %v2842_v47 = vld [vmem:[#allocation5 + $0x4e0] sm:$0xf]  ;;  %v3333_v53 = vld [vmem:[#allocation5 + $0x454] sm:$0xf0]  ;;  %v3204_v58 = vld [vmem:[#allocation5 + $0x54] sm:$0xf] }
  0x52   :  { %1268 = vmatpush.bf16.msrb.mxu3 %v2691_v39  ;;  %v2866_v39 = vld [vmem:[#allocation5 + $0x510] sm:$0xf]  ;;  %v2858_v56 = vld [vmem:[#allocation5 + $0x500] sm:$0xf]  ;;  %v2260_v60 = vld [vmem:[#allocation5 + $0x58] sm:$0xf0] }
  0x53   :  { %1240 = vmatpush.bf16.msrb.mxu1 %v2563_v43  ;;  %v3206_v43 = vld [vmem:[#allocation5 + $0x64] sm:$0xf]  ;;  %v2867_v50 = vor.u32 %v3357_v40, %v2866_v39  ;;  %v3224_v61 = vld [vmem:[#allocation5 + $0xf4] sm:$0xf]  ;;  %v2340_v62 = vld [vmem:[#allocation5 + $0xf8] sm:$0xf0]  ;;  %v2263_v7 = vor.u32 %v3204_v58, %v2260_v60 }
  0x54   :  { %1227 = vmatpush.bf16.msrb.mxu0 %v2491_v48  ;;  %v3351_v48 = vld [vmem:[#allocation5 + $0x4e4] sm:$0xf0]  ;;  %v2271_v54 = vor.u32 %v3206_v43, %v2268_v44  ;;  %v2834_v0 = vld [vmem:[#allocation5 + $0x4d0] sm:$0xf]  ;;  %v2762_v5 = vld [vmem:[#allocation5 + $0x440] sm:$0xf] }
  0x55   :  { %1255 = vmatpush.bf16.msrb.mxu2 %v2619_v49  ;;  %v3750_v49 = vpack.c.bf16 %v142_v38, %v131_v29  ;;  %v2843_v59 = vor.u32 %v3351_v48, %v2842_v47  ;;  %v3331_v6 = vld [vmem:[#allocation5 + $0x444] sm:$0xf0]  ;;  %v3202_v9 = vld [vmem:[#allocation5 + $0x44] sm:$0xf]  ;;  %v2252_v11 = vld [vmem:[#allocation5 + $0x48] sm:$0xf0] }
  0x56   :  { %1269 = vmatpush.bf16.msrb.mxu3 %v2683_v52  ;;  %v2770_v52 = vld [vmem:[#allocation5 + $0x450] sm:$0xf]  ;;  %v2332_v13 = vld [vmem:[#allocation5 + $0xe8] sm:$0xf0]  ;;  %v2763_v15 = vor.u32 %v3331_v6, %v2762_v5  ;;  %v2826_v16 = vld [vmem:[#allocation5 + $0x4c0] sm:$0xf]  ;;  %v2255_v20 = vor.u32 %v3202_v9, %v2252_v11 }
  0x57   :  { %1241 = vmatpush.bf16.msrb.mxu1 %v2555_v57  ;;  %v3355_v57 = vld [vmem:[#allocation5 + $0x504] sm:$0xf0]  ;;  %v2771_v63 = vor.u32 %v3333_v53, %v2770_v52  ;;  %v2754_v18 = vld [vmem:[#allocation5 + $0x430] sm:$0xf]  ;;  %v3329_v19 = vld [vmem:[#allocation5 + $0x434] sm:$0xf0] }
  0x58   :  { %1228 = vmatpush.bf16.msrb.mxu0 %v2483_v1  ;;  %v3349_v1 = vld [vmem:[#allocation5 + $0x4d4] sm:$0xf0]  ;;  %v3347_v17 = vld [vmem:[#allocation5 + $0x4c4] sm:$0xf0]  ;;  %v2244_v23 = vld [vmem:[#allocation5 + $0x38] sm:$0xf0]  ;;  %v2755_v28 = vor.u32 %v3329_v19, %v2754_v18 }
  0x59   :  { %1256 = vmatpush.bf16.msrb.mxu2 %v2611_v4  ;;  %v2859_v4 = vor.u32 %v3355_v57, %v2858_v56  ;;  %v2835_v10 = vor.u32 %v3349_v1, %v2834_v0  ;;  %v2827_v24 = vor.u32 %v3347_v17, %v2826_v16  ;;  %v3220_v25 = vld [vmem:[#allocation5 + $0xd4] sm:$0xf]  ;;  %v3345_v29 = vld [vmem:[#allocation5 + $0x4b4] sm:$0xf0]  ;;  %v136_v30 = vld [vmem:[#allocation2 + $0x50] sm:$0xff] }
  0x5a   :  { %1270 = vmatpush.bf16.msrb.mxu3 %v2675_v8  ;;  %v2343_v8 = vor.u32 %v3224_v61, %v2340_v62  ;;  %v2746_v32 = vld [vmem:[#allocation5 + $0x420] sm:$0xf]  ;;  %v3327_v33 = vld [vmem:[#allocation5 + $0x424] sm:$0xf0]  ;;  %v2236_v39 = vld [vmem:[#allocation5 + $0x28] sm:$0xf0] }
  0x5b   :  { %1242 = vmatpush.bf16.msrb.mxu1 %v2547_v12  ;;  %v3222_v12 = vld [vmem:[#allocation5 + $0xe4] sm:$0xf]  ;;  %v2747_v44 = vor.u32 %v3327_v33, %v2746_v32  ;;  %v3343_v47 = vld [vmem:[#allocation5 + $0x4a4] sm:$0xf0]  ;;  %v2738_v48 = vld [vmem:[#allocation5 + $0x410] sm:$0xf] }
  0x5c   :  { %1229 = vmatpush.bf16.msrb.mxu0 %v2475_v21  ;;  %v2335_v21 = vor.u32 %v3222_v12, %v2332_v13  ;;  %v3218_v40 = vld [vmem:[#allocation5 + $0xc4] sm:$0xf]  ;;  %v2228_v57 = vld [vmem:[#allocation5 + $0x18] sm:$0xf0]  ;;  %v3216_v58 = vld [vmem:[#allocation5 + $0xb4] sm:$0xf] }
  0x5d   :  { %1257 = vmatpush.bf16.msrb.mxu2 %v2603_v22  ;;  %v3200_v22 = vld [vmem:[#allocation5 + $0x34] sm:$0xf]  ;;  %v2802_v61 = vld [vmem:[#allocation5 + $0x490] sm:$0xf]  ;;  %v3341_v62 = vld [vmem:[#allocation5 + $0x494] sm:$0xf0] }
  0x5e   :  { %1271 = vmatpush.bf16.msrb.mxu3 %v2667_v26  ;;  %v2324_v26 = vld [vmem:[#allocation5 + $0xd8] sm:$0xf0]  ;;  %v2247_v34 = vor.u32 %v3200_v22, %v2244_v23  ;;  %v3323_v0 = vld [vmem:[#allocation5 + $0x404] sm:$0xf0]  ;;  %v3194_v1 = vld [vmem:[#allocation5 + $0x4] sm:$0xf] }
  0x5f   :  { %1243 = vmatpush.bf16.msrb.mxu1 %v2539_v36  ;;  %1230 = vmatmul.bf16.vlgmr.msrb.gmra.mxu0 %v3744_v37  ;;  %v3198_v36 = vld [vmem:[#allocation5 + $0x24] sm:$0xf]  ;;  %v2404_v9 = vld [vmem:[#allocation5 + $0x178] sm:$0xf0]  ;;  %v2300_v11 = vld [vmem:[#allocation5 + $0xa8] sm:$0xf0] }
  0x60   :  { %1278 = vmatpush.bf16.msra.mxu0 %v2787_v27  ;;  %1258 = vmatmul.bf16.vlgmr.msrb.gmra.mxu2 %v3746_v41  ;;  %v2818_v27 = vld [vmem:[#allocation5 + $0x4b0] sm:$0xf]  ;;  %v2239_v52 = vor.u32 %v3198_v36, %v2236_v39  ;;  %v3272_v12 = vld [vmem:[#allocation5 + $0x274] sm:$0xf]  ;;  %v2532_v13 = vld [vmem:[#allocation5 + $0x278] sm:$0xf0] }
  0x61   :  { %1311 = vmatpush.bf16.msra.mxu2 %v1161_v35  ;;  %1272 = vmatmul.bf16.vlgmr.msrb.gmra.mxu3 %v3748_v45  ;;  %v2327_v35 = vor.u32 %v3220_v25, %v2324_v26  ;;  %v2819_v38 = vor.u32 %v3345_v29, %v2818_v27  ;;  %v2794_v16 = vld [vmem:[#allocation5 + $0x480] sm:$0xf]  ;;  %v3339_v17 = vld [vmem:[#allocation5 + $0x484] sm:$0xf0]  ;;  %v134_v18 = vld [vmem:[#allocation2 + $0x40] sm:$0xff] }
  0x62   :  { %1320 = vmatpush.bf16.msra.mxu3 %v2279_v31  ;;  %1244 = vmatmul.bf16.vlgmr.msrb.gmra.mxu1 %v3750_v49  ;;  %v147_v31 = vld [vmem:[#allocation2 + $0xa8] sm:$0xff]  ;;  %v3238_v26 = vld [vmem:[#allocation5 + $0x164] sm:$0xf]  ;;  %v2396_v27 = vld [vmem:[#allocation5 + $0x168] sm:$0xf0]  ;;  %v2795_v29 = vor.u32 %v3339_v17, %v2794_v16 }
  0x63   :  { %1292 = vmatpush.bf16.msra.mxu1 %v2851_v42  ;;  %v2316_v42 = vld [vmem:[#allocation5 + $0xc8] sm:$0xf0]  ;;  %v3756_v43 = vpack.c.bf16 %v147_v31, %v136_v30  ;;  %v2468_v22 = vld [vmem:[#allocation5 + $0x1f8] sm:$0xf0]  ;;  %v146_v30 = vld [vmem:[#allocation2 + $0xa0] sm:$0xff] }
  0x64   :  { %1279 = vmatpush.bf16.msra.mxu0 %v2779_v46  ;;  %v2810_v46 = vld [vmem:[#allocation5 + $0x4a0] sm:$0xf]  ;;  %v2319_v53 = vor.u32 %v3218_v40, %v2316_v42  ;;  %v135_v25 = vld [vmem:[#allocation2 + $0x48] sm:$0xff]  ;;  %v3212_v31 = vld [vmem:[#allocation5 + $0x94] sm:$0xf] }
  0x65   :  { %1312 = vmatpush.bf16.msra.mxu2 %v2867_v50  ;;  %v3325_v50 = vld [vmem:[#allocation5 + $0x414] sm:$0xf0]  ;;  %v2811_v56 = vor.u32 %v3343_v47, %v2810_v46  ;;  %v2292_v32 = vld [vmem:[#allocation5 + $0x98] sm:$0xf0]  ;;  %v2524_v36 = vld [vmem:[#allocation5 + $0x268] sm:$0xf0]  ;;  %v3762_v42 = vpack.c.bf16 %v146_v30, %v135_v25 }
  0x66   :  { %1321 = vmatpush.bf16.msra.mxu3 %v2271_v54  ;;  %v3196_v54 = vld [vmem:[#allocation5 + $0x14] sm:$0xf]  ;;  %v2739_v60 = vor.u32 %v3325_v50, %v2738_v48  ;;  %v3254_v39 = vld [vmem:[#allocation5 + $0x1e4] sm:$0xf]  ;;  %v2460_v40 = vld [vmem:[#allocation5 + $0x1e8] sm:$0xf0] }
  0x67   :  { %1293 = vmatpush.bf16.msra.mxu1 %v2843_v59  ;;  %v2308_v59 = vld [vmem:[#allocation5 + $0xb8] sm:$0xf0]  ;;  %v2231_v5 = vor.u32 %v3196_v54, %v2228_v57  ;;  %v3236_v46 = vld [vmem:[#allocation5 + $0x154] sm:$0xf]  ;;  %v3210_v50 = vld [vmem:[#allocation5 + $0x84] sm:$0xf]  ;;  %v2463_v54 = vor.u32 %v3254_v39, %v2460_v40 }
  0x68   :  { %1280 = vmatpush.bf16.msra.mxu0 %v2771_v63  ;;  %v2730_v63 = vld [vmem:[#allocation5 + $0x400] sm:$0xf]  ;;  %v2311_v6 = vor.u32 %v3216_v58, %v2308_v59  ;;  %v2388_v47 = vld [vmem:[#allocation5 + $0x158] sm:$0xf0]  ;;  %v3288_v57 = vld [vmem:[#allocation5 + $0x2f4] sm:$0xf] }
  0x69   :  { %1313 = vmatpush.bf16.msra.mxu2 %v2859_v4  ;;  %v2220_v4 = vld [vmem:[#allocation5 + $0x8] sm:$0xf0]  ;;  %v2596_v58 = vld [vmem:[#allocation5 + $0x2f8] sm:$0xf0]  ;;  %v2391_v59 = vor.u32 %v3236_v46, %v2388_v47  ;;  %v3264_v17 = vld [vmem:[#allocation5 + $0x234] sm:$0xf] }
  0x6a   :  { %1322 = vmatpush.bf16.msra.mxu3 %v2263_v7  ;;  %v3214_v7 = vld [vmem:[#allocation5 + $0xa4] sm:$0xf]  ;;  %v2223_v23 = vor.u32 %v3194_v1, %v2220_v4  ;;  %v2599_v4 = vor.u32 %v3288_v57, %v2596_v58  ;;  %v2492_v30 = vld [vmem:[#allocation5 + $0x228] sm:$0xf0]  ;;  %v3228_v39 = vld [vmem:[#allocation5 + $0x114] sm:$0xf] }
  0x6b   :  { %1294 = vmatpush.bf16.msra.mxu1 %v2835_v10  ;;  %v2803_v10 = vor.u32 %v3341_v62, %v2802_v61  ;;  %v2452_v61 = vld [vmem:[#allocation5 + $0x1d8] sm:$0xf0]  ;;  %v3230_v25 = vld [vmem:[#allocation5 + $0x124] sm:$0xf]  ;;  %v3260_v46 = vld [vmem:[#allocation5 + $0x214] sm:$0xf] }
  0x6c   :  { %1281 = vmatpush.bf16.msra.mxu0 %v2763_v15  ;;  %v2731_v15 = vor.u32 %v3323_v0, %v2730_v63  ;;  %v3234_v63 = vld [vmem:[#allocation5 + $0x144] sm:$0xf]  ;;  %v2380_v0 = vld [vmem:[#allocation5 + $0x148] sm:$0xf0]  ;;  %v2356_v40 = vld [vmem:[#allocation5 + $0x118] sm:$0xf0] }
  0x6d   :  { %1334 = vmatpush.bf16.msrb.mxu2 %v2343_v8  ;;  %v3240_v8 = vld [vmem:[#allocation5 + $0x174] sm:$0xf]  ;;  %v3226_v57 = vld [vmem:[#allocation5 + $0x104] sm:$0xf]  ;;  %v2348_v58 = vld [vmem:[#allocation5 + $0x108] sm:$0xf0] }
  0x6e   :  { %1323 = vmatpush.bf16.msra.mxu3 %v2255_v20  ;;  %v2407_v19 = vor.u32 %v3240_v8, %v2404_v9  ;;  %v145_v20 = vld [vmem:[#allocation2 + $0x98] sm:$0xff]  ;;  %v3286_v8 = vld [vmem:[#allocation5 + $0x2e4] sm:$0xf] }
  0x6f   :  { %1295 = vmatpush.bf16.msra.mxu1 %v2827_v24  ;;  %v2303_v24 = vor.u32 %v3214_v7, %v2300_v11  ;;  %v3760_v33 = vpack.c.bf16 %v145_v20, %v134_v18  ;;  %v2508_v7 = vld [vmem:[#allocation5 + $0x248] sm:$0xf0]  ;;  %v3250_v11 = vld [vmem:[#allocation5 + $0x1c4] sm:$0xf]  ;;  %v3284_v20 = vld [vmem:[#allocation5 + $0x2d4] sm:$0xf] }
  0x70   :  { %1282 = vmatpush.bf16.msra.mxu0 %v2755_v28  ;;  %2872 = vmatmul.msk.bf16.vlgmr.msra.gmra.mxu2 %vm1155_vm1, %v3756_v43  ;;  %v2535_v28 = vor.u32 %v3272_v12, %v2532_v13  ;;  %v2588_v9 = vld [vmem:[#allocation5 + $0x2e8] sm:$0xf0]  ;;  %v2372_v13 = vld [vmem:[#allocation5 + $0x138] sm:$0xf0] }
  0x71   :  { %1335 = vmatpush.bf16.msrb.mxu2 %v2335_v21  ;;  %v3256_v21 = vld [vmem:[#allocation5 + $0x1f4] sm:$0xf]  ;;  %v2444_v12 = vld [vmem:[#allocation5 + $0x1c8] sm:$0xf0]  ;;  %v2591_v16 = vor.u32 %v3286_v8, %v2588_v9  ;;  %v2788_v8 = vld [vmem:[#allocation5 + $0x478] sm:$0xf0] }
  0x72   :  { %1324 = vmatpush.bf16.msra.mxu3 %v2247_v34  ;;  %v2471_v34 = vor.u32 %v3256_v21, %v2468_v22  ;;  %v2447_v18 = vor.u32 %v3250_v11, %v2444_v12  ;;  %v2580_v21 = vld [vmem:[#allocation5 + $0x2d8] sm:$0xf0]  ;;  %v3242_v9 = vld [vmem:[#allocation5 + $0x184] sm:$0xf]  ;;  %v3320_v12 = vld [vmem:[#allocation5 + $0x3f4] sm:$0xf] }
  0x73   :  { %1296 = vmatpush.bf16.msra.mxu1 %v2819_v38  ;;  %v2399_v38 = vor.u32 %v3238_v26, %v2396_v27  ;;  %v2364_v26 = vld [vmem:[#allocation5 + $0x128] sm:$0xf0] }
  0x74   :  { %1283 = vmatpush.bf16.msra.mxu0 %v2747_v44  ;;  %v2295_v44 = vor.u32 %v3212_v31, %v2292_v32  ;;  %v3282_v32 = vld [vmem:[#allocation5 + $0x2c4] sm:$0xf] }
  0x75   :  { %1336 = vmatpush.bf16.msrb.mxu2 %v2327_v35  ;;  %v3270_v35 = vld [vmem:[#allocation5 + $0x264] sm:$0xf] }
  0x76   :  { %1325 = vmatpush.bf16.msra.mxu3 %v2239_v52  ;;  %v2527_v48 = vor.u32 %v3270_v35, %v2524_v36  ;;  %v2284_v52 = vld [vmem:[#allocation5 + $0x88] sm:$0xf0]  ;;  %v2367_v35 = vor.u32 %v3230_v25, %v2364_v26  ;;  %v3246_v36 = vld [vmem:[#allocation5 + $0x1a4] sm:$0xf] }
  0x77   :  { %1297 = vmatpush.bf16.msra.mxu1 %v2811_v56  ;;  %v2516_v56 = vld [vmem:[#allocation5 + $0x258] sm:$0xf0]  ;;  %v2287_v62 = vor.u32 %v3210_v50, %v2284_v52  ;;  %v3280_v50 = vld [vmem:[#allocation5 + $0x2b4] sm:$0xf]  ;;  %v3318_v26 = vld [vmem:[#allocation5 + $0x3e4] sm:$0xf] }
  0x78   :  { %1284 = vmatpush.bf16.msra.mxu0 %v2739_v60  ;;  %v3252_v60 = vld [vmem:[#allocation5 + $0x1d4] sm:$0xf]  ;;  %v2564_v52 = vld [vmem:[#allocation5 + $0x2b8] sm:$0xf0] }
  0x79   :  { %1337 = vmatpush.bf16.msrb.mxu2 %v2319_v53  ;;  %v3268_v53 = vld [vmem:[#allocation5 + $0x254] sm:$0xf] }
  0x7a   :  { %1326 = vmatpush.bf16.msra.mxu3 %v2231_v5  ;;  %v2519_v1 = vor.u32 %v3268_v53, %v2516_v56  ;;  %v3266_v5 = vld [vmem:[#allocation5 + $0x244] sm:$0xf]  ;;  %v2359_v53 = vor.u32 %v3228_v39, %v2356_v40  ;;  %v2420_v56 = vld [vmem:[#allocation5 + $0x198] sm:$0xf0]  ;;  %v3352_v39 = vld [vmem:[#allocation5 + $0x4f4] sm:$0xf] }
  0x7b   :  { %1298 = vmatpush.bf16.msra.mxu1 %v2803_v10  ;;  %v2383_v10 = vor.u32 %v3234_v63, %v2380_v0  ;;  %v3304_v63 = vld [vmem:[#allocation5 + $0x374] sm:$0xf]  ;;  %v2660_v0 = vld [vmem:[#allocation5 + $0x378] sm:$0xf0] }
  0x7c   :  { %1285 = vmatpush.bf16.msra.mxu0 %v2731_v15  ;;  %v2511_v15 = vor.u32 %v3266_v5, %v2508_v7  ;;  %v2556_v5 = vld [vmem:[#allocation5 + $0x2a8] sm:$0xf0]  ;;  %v2351_v7 = vor.u32 %v3226_v57, %v2348_v58  ;;  %v2663_v11 = vor.u32 %v3304_v63, %v2660_v0  ;;  %v2852_v40 = vld [vmem:[#allocation5 + $0x4f8] sm:$0xf0]  ;;  %v3350_v57 = vld [vmem:[#allocation5 + $0x4e4] sm:$0xf] }
  0x7d   :  { %1338 = vmatpush.bf16.msrb.mxu2 %v2311_v6  ;;  %v2455_v6 = vor.u32 %v3252_v60, %v2452_v61  ;;  %v2567_v61 = vor.u32 %v3280_v50, %v2564_v52  ;;  %v2636_v50 = vld [vmem:[#allocation5 + $0x348] sm:$0xf0]  ;;  %v3328_v0 = vld [vmem:[#allocation5 + $0x434] sm:$0xf] }
  0x7e   :  { %1327 = vmatpush.bf16.msra.mxu3 %v2223_v23  ;;  %v3248_v23 = vld [vmem:[#allocation5 + $0x1b4] sm:$0xf]  ;;  %v2844_v58 = vld [vmem:[#allocation5 + $0x4e8] sm:$0xf0] }
  0x7f   :  { %1299 = vmatpush.bf16.msra.mxu1 %v2795_v29  ;;  %1286 = vmatmul.bf16.vlgmr.msra.gmra.mxu0 %v3760_v33  ;;  %v3262_v29 = vld [vmem:[#allocation5 + $0x224] sm:$0xf]  ;;  %v2847_v63 = vor.u32 %v3350_v57, %v2844_v58  ;;  %v2868_v57 = vld [vmem:[#allocation5 + $0x518] sm:$0xf0] }
  0x80   :  { %1348 = vmatpush.bf16.msrb.mxu0 %v2407_v19  ;;  %v2500_v19 = vld [vmem:[#allocation5 + $0x238] sm:$0xf0] }
  0x81   :  { %1339 = vmatpush.bf16.msrb.mxu2 %v2303_v24  ;;  %1328 = vmatmul.bf16.vlgmr.msra.gmra.mxu3 %v3730_v2  ;;  %v3232_v2 = vld [vmem:[#allocation5 + $0x134] sm:$0xf]  ;;  %v2436_v24 = vld [vmem:[#allocation5 + $0x1b8] sm:$0xf0]  ;;  %v2503_v27 = vor.u32 %v3264_v17, %v2500_v19  ;;  %v2652_v17 = vld [vmem:[#allocation5 + $0x368] sm:$0xf0] }
  0x82   :  { %1376 = vmatpush.bf16.msrb.mxu3 %v2535_v28  ;;  %1300 = vmatmul.bf16.vlgmr.msra.gmra.mxu1 %v3762_v42  ;;  %v2375_v22 = vor.u32 %v3232_v2, %v2372_v13  ;;  %v2583_v28 = vor.u32 %v3284_v20, %v2580_v21  ;;  %v2439_v31 = vor.u32 %v3248_v23, %v2436_v24  ;;  %v2724_v2 = vld [vmem:[#allocation5 + $0x3f8] sm:$0xf0]  ;;  %v3276_v20 = vld [vmem:[#allocation5 + $0x294] sm:$0xf]  ;;  %v3334_v23 = vld [vmem:[#allocation5 + $0x464] sm:$0xf] }
  0x83   :  { %1362 = vmatpush.bf16.msrb.mxu1 %v2471_v34  ;;  %v2572_v34 = vld [vmem:[#allocation5 + $0x2c8] sm:$0xf0]  ;;  %v2548_v21 = vld [vmem:[#allocation5 + $0x298] sm:$0xf0] }
  0x84   :  { %1349 = vmatpush.bf16.msrb.mxu0 %v2399_v38  ;;  %v2428_v38 = vld [vmem:[#allocation5 + $0x1a8] sm:$0xf0] }
  0x85   :  { %1340 = vmatpush.bf16.msrb.mxu2 %v2295_v44  ;;  %v2575_v44 = vor.u32 %v3282_v32, %v2572_v34  ;;  %v2431_v47 = vor.u32 %v3246_v36, %v2428_v38  ;;  %v2780_v24 = vld [vmem:[#allocation5 + $0x468] sm:$0xf0]  ;;  %v3274_v32 = vld [vmem:[#allocation5 + $0x284] sm:$0xf]  ;;  %v2772_v38 = vld [vmem:[#allocation5 + $0x458] sm:$0xf0] }
  0x86   :  { %1377 = vmatpush.bf16.msrb.mxu3 %v2527_v48  ;;  %v2484_v48 = vld [vmem:[#allocation5 + $0x218] sm:$0xf0]  ;;  %v2540_v34 = vld [vmem:[#allocation5 + $0x288] sm:$0xf0] }
  0x87   :  { %1363 = vmatpush.bf16.msrb.mxu1 %v2463_v54  ;;  %v3244_v54 = vld [vmem:[#allocation5 + $0x194] sm:$0xf]  ;;  %v2487_v60 = vor.u32 %v3260_v46, %v2484_v48  ;;  %v2708_v46 = vld [vmem:[#allocation5 + $0x3d8] sm:$0xf0]  ;;  %v3298_v48 = vld [vmem:[#allocation5 + $0x344] sm:$0xf] }
  0x88   :  { %1350 = vmatpush.bf16.msrb.mxu0 %v2391_v59  ;;  %v3258_v59 = vld [vmem:[#allocation5 + $0x204] sm:$0xf] }
  0x89   :  { %1341 = vmatpush.bf16.msrb.mxu2 %v2287_v62  ;;  %v2476_v62 = vld [vmem:[#allocation5 + $0x208] sm:$0xf0] }
  0x8a   :  { %1378 = vmatpush.bf16.msrb.mxu3 %v2519_v1  ;;  %v2423_v1 = vor.u32 %v3244_v54, %v2420_v56  ;;  %v2479_v13 = vor.u32 %v3258_v59, %v2476_v62  ;;  %v3330_v54 = vld [vmem:[#allocation5 + $0x444] sm:$0xf]  ;;  %v2764_v56 = vld [vmem:[#allocation5 + $0x448] sm:$0xf0]  ;;  %v2628_v62 = vld [vmem:[#allocation5 + $0x338] sm:$0xf0] }
  0x8b   :  { %1364 = vmatpush.bf16.msrb.mxu1 %v2455_v6  ;;  %v3336_v6 = vld [vmem:[#allocation5 + $0x474] sm:$0xf]  ;;  %v3314_v59 = vld [vmem:[#allocation5 + $0x3c4] sm:$0xf] }
  0x8c   :  { %1351 = vmatpush.bf16.msrb.mxu0 %v2383_v10  ;;  %1342 = vmatmul.bf16.vlgmr.msrb.gmra.mxu2 %v3737_v14  ;;  %v2495_v14 = vor.u32 %v3262_v29, %v2492_v30  ;;  %v2412_v10 = vld [vmem:[#allocation5 + $0x188] sm:$0xf0]  ;;  %v3300_v29 = vld [vmem:[#allocation5 + $0x354] sm:$0xf]  ;;  %v2644_v30 = vld [vmem:[#allocation5 + $0x358] sm:$0xf0] }
  0x8d   :  { %1390 = vmatpush.bf16.msra.mxu2 %v2599_v4  ;;  %v3278_v4 = vld [vmem:[#allocation5 + $0x2a4] sm:$0xf]  ;;  %v2415_v19 = vor.u32 %v3242_v9, %v2412_v10  ;;  %v2692_v9 = vld [vmem:[#allocation5 + $0x3b8] sm:$0xf0] }
  0x8e   :  { %1379 = vmatpush.bf16.msrb.mxu3 %v2511_v15  ;;  %v2559_v15 = vor.u32 %v3278_v4, %v2556_v5  ;;  %v2756_v4 = vld [vmem:[#allocation5 + $0x438] sm:$0xf0]  ;;  %v3348_v5 = vld [vmem:[#allocation5 + $0x4d4] sm:$0xf]  ;;  %v3294_v10 = vld [vmem:[#allocation5 + $0x324] sm:$0xf] }
  0x8f   :  { %1365 = vmatpush.bf16.msrb.mxu1 %v2447_v18  ;;  %v2791_v18 = vor.u32 %v3336_v6, %v2788_v8  ;;  %v2836_v6 = vld [vmem:[#allocation5 + $0x4d8] sm:$0xf0]  ;;  %v3312_v8 = vld [vmem:[#allocation5 + $0x3b4] sm:$0xf] }
  0x90   :  { %1352 = vmatpush.bf16.msrb.mxu0 %v2375_v22  ;;  %v2727_v22 = vor.u32 %v3320_v12, %v2724_v2  ;;  %v2759_v12 = vor.u32 %v3328_v0, %v2756_v4  ;;  %v2839_v2 = vor.u32 %v3348_v5, %v2836_v6  ;;  %v2796_v0 = vld [vmem:[#allocation5 + $0x488] sm:$0xf0]  ;;  %v2932_v5 = vld [vmem:[#allocation8 + $0x70] sm:$0xf]  ;;  %v3373_v6 = vld [vmem:[#allocation8 + $0x74] sm:$0xf0] }
  0x91   :  { %1391 = vmatpush.bf16.msra.mxu2 %v2591_v16  ;;  %v3302_v16 = vld [vmem:[#allocation5 + $0x364] sm:$0xf] }
  0x92   :  { %1380 = vmatpush.bf16.msrb.mxu3 %v2503_v27  ;;  %v2655_v25 = vor.u32 %v3302_v16, %v2652_v17  ;;  %v2716_v27 = vld [vmem:[#allocation5 + $0x3e8] sm:$0xf0]  ;;  %v3346_v17 = vld [vmem:[#allocation5 + $0x4c4] sm:$0xf] }
  0x93   :  { %1366 = vmatpush.bf16.msrb.mxu1 %v2439_v31  ;;  %v2783_v31 = vor.u32 %v3334_v23, %v2780_v24  ;;  %v2719_v36 = vor.u32 %v3318_v26, %v2716_v27  ;;  %v2748_v16 = vld [vmem:[#allocation5 + $0x428] sm:$0xf0]  ;;  %v824_v26 = vunpack.c.h.b16 %v3740_v51 }
  0x94   :  { %1353 = vmatpush.bf16.msrb.mxu0 %v2367_v35  ;;  %v3332_v35 = vld [vmem:[#allocation5 + $0x454] sm:$0xf]  ;;  %v2732_v51 = vld [vmem:[#allocation5 + $0x408] sm:$0xf0] }
  0x95   :  { %1392 = vmatpush.bf16.msra.mxu2 %v2583_v28  ;;  %v2551_v28 = vor.u32 %v3276_v20, %v2548_v21  ;;  %v2775_v52 = vor.u32 %v3332_v35, %v2772_v38  ;;  %v3310_v20 = vld [vmem:[#allocation5 + $0x3a4] sm:$0xf]  ;;  %v3292_v21 = vld [vmem:[#allocation5 + $0x314] sm:$0xf] }
  0x96   :  { %1381 = vmatpush.bf16.msrb.mxu3 %v2495_v14  ;;  %v2647_v14 = vor.u32 %v3300_v29, %v2644_v30  ;;  %v3344_v29 = vld [vmem:[#allocation5 + $0x4b4] sm:$0xf]  ;;  %v2820_v30 = vld [vmem:[#allocation5 + $0x4b8] sm:$0xf0]  ;;  %v3290_v35 = vld [vmem:[#allocation5 + $0x304] sm:$0xf] }
  0x97   :  { %1367 = vmatpush.bf16.msrb.mxu1 %v2431_v47  ;;  %v2543_v47 = vor.u32 %v3274_v32, %v2540_v34  ;;  %v3308_v32 = vld [vmem:[#allocation5 + $0x394] sm:$0xf]  ;;  %v2676_v34 = vld [vmem:[#allocation5 + $0x398] sm:$0xf0] }
  0x98   :  { %1354 = vmatpush.bf16.msrb.mxu0 %v2359_v53  ;;  %v2855_v53 = vor.u32 %v3352_v39, %v2852_v40  ;;  %v2823_v39 = vor.u32 %v3344_v29, %v2820_v30  ;;  %v3322_v40 = vld [vmem:[#allocation5 + $0x404] sm:$0xf]  ;;  %v2900_v29 = vld [vmem:[#allocation8 + $0x30] sm:$0xf] }
  0x99   :  { %1393 = vmatpush.bf16.msra.mxu2 %v2575_v44  ;;  %v3316_v44 = vld [vmem:[#allocation5 + $0x3d4] sm:$0xf]  ;;  %v3365_v30 = vld [vmem:[#allocation8 + $0x34] sm:$0xf0] }
  0x9a   :  { %1382 = vmatpush.bf16.msrb.mxu3 %v2487_v60  ;;  %v2700_v60 = vld [vmem:[#allocation5 + $0x3c8] sm:$0xf0] }
  0x9b   :  { %1368 = vmatpush.bf16.msrb.mxu1 %v2423_v1  ;;  %v2703_v1 = vor.u32 %v3314_v59, %v2700_v60  ;;  %v2804_v59 = vld [vmem:[#allocation5 + $0x498] sm:$0xf0] }
  0x9c   :  { %1355 = vmatpush.bf16.msrb.mxu0 %v2351_v7 }
  0x9d   :  { %1394 = vmatpush.bf16.msra.mxu2 %v2567_v61  ;;  %v3296_v61 = vld [vmem:[#allocation5 + $0x334] sm:$0xf] }
  0x9e   :  { %1383 = vmatpush.bf16.msrb.mxu3 %v2479_v13  ;;  %v2631_v7 = vor.u32 %v3296_v61, %v2628_v62  ;;  %v3326_v13 = vld [vmem:[#allocation5 + $0x424] sm:$0xf] }
  0x9f   :  { %1369 = vmatpush.bf16.msrb.mxu1 %v2415_v19  ;;  %1356 = vmatmul.bf16.vlgmr.msrb.gmra.mxu0 %v3728_v55  ;;  %v2711_v55 = vor.u32 %v3316_v44, %v2708_v46  ;;  %v2751_v23 = vor.u32 %v3326_v13, %v2748_v16  ;;  %v2679_v44 = vor.u32 %v3308_v32, %v2676_v34  ;;  %v3342_v46 = vld [vmem:[#allocation5 + $0x4a4] sm:$0xf]  ;;  %v2916_v13 = vld [vmem:[#allocation8 + $0x50] sm:$0xf] }
  0xa0   :  { %1404 = vmatpush.bf16.msra.mxu0 %v2663_v11  ;;  %v2620_v11 = vld [vmem:[#allocation5 + $0x328] sm:$0xf0]  ;;  %v3354_v62 = vld [vmem:[#allocation5 + $0x504] sm:$0xf] }
  0xa1   :  { %1395 = vmatpush.bf16.msra.mxu2 %v2559_v15  ;;  %1384 = vmatmul.bf16.vlgmr.msrb.gmra.mxu3 %v3744_v37  ;;  %v2639_v37 = vor.u32 %v3298_v48, %v2636_v50  ;;  %v2695_v15 = vor.u32 %v3312_v8, %v2692_v9  ;;  %v2623_v19 = vor.u32 %v3294_v10, %v2620_v11  ;;  %v3306_v50 = vld [vmem:[#allocation5 + $0x384] sm:$0xf]  ;;  %v2924_v9 = vld [vmem:[#allocation8 + $0x60] sm:$0xf]  ;;  %v3370_v11 = vld [vmem:[#allocation8 + $0x64] sm:$0xf] }
  0xa2   :  { %1432 = vmatpush.bf16.msra.mxu3 %v2791_v18  ;;  %1370 = vmatmul.bf16.vlgmr.msrb.gmra.mxu1 %v3732_v3  ;;  %v2767_v3 = vor.u32 %v3330_v54, %v2764_v56  ;;  %v2828_v18 = vld [vmem:[#allocation5 + $0x4c8] sm:$0xf0]  ;;  %v3356_v56 = vld [vmem:[#allocation5 + $0x514] sm:$0xf]  ;;  %v2934_v8 = vld [vmem:[#allocation8 + $0x78] sm:$0xf0] }
  0xa3   :  { %1418 = vmatpush.bf16.msra.mxu1 %v2727_v22  ;;  %v2612_v22 = vld [vmem:[#allocation5 + $0x318] sm:$0xf0]  ;;  %v2831_v24 = vor.u32 %v3346_v17, %v2828_v18  ;;  %v2871_v60 = vor.u32 %v3356_v56, %v2868_v57  ;;  %v2918_v16 = vld [vmem:[#allocation8 + $0x58] sm:$0xf0] }
  0xa4   :  { %1405 = vmatpush.bf16.msra.mxu0 %v2655_v25  ;;  %v3324_v25 = vld [vmem:[#allocation5 + $0x414] sm:$0xf]  ;;  %v2886_v57 = vld [vmem:[#allocation8 + $0x18] sm:$0xf0] }
  0xa5   :  { %1396 = vmatpush.bf16.msra.mxu2 %v2551_v28  ;;  %v2740_v28 = vld [vmem:[#allocation5 + $0x418] sm:$0xf0] }
  0xa6   :  { %1433 = vmatpush.bf16.msra.mxu3 %v2783_v31  ;;  %v2615_v31 = vor.u32 %v3292_v21, %v2612_v22  ;;  %v2743_v38 = vor.u32 %v3324_v25, %v2740_v28  ;;  %v2908_v22 = vld [vmem:[#allocation8 + $0x40] sm:$0xf] }
  0xa7   :  { %1419 = vmatpush.bf16.msra.mxu1 %v2719_v36  ;;  %v2604_v36 = vld [vmem:[#allocation5 + $0x308] sm:$0xf0] }
  0xa8   :  { %1406 = vmatpush.bf16.msra.mxu0 %v2647_v14  ;;  %v990_v14 = vpack.c.b16 %v824_v26, %v824_v26  ;;  %v2607_v48 = vor.u32 %v3290_v35, %v2604_v36  ;;  %v2910_v26 = vld [vmem:[#allocation8 + $0x48] sm:$0xf0]  ;;  %v2901_v35 = vor.u32 %v3365_v30, %v2900_v29  ;;  %v2902_v36 = vld [vmem:[#allocation8 + $0x38] sm:$0xf0] }
  0xa9   :  { %1397 = vmatpush.bf16.msra.mxu2 %v2543_v47  ;;  %v2812_v47 = vld [vmem:[#allocation5 + $0x4a8] sm:$0xf0] }
  0xaa   :  { %1434 = vmatpush.bf16.msra.mxu3 %v2775_v52  ;;  %v2668_v52 = vld [vmem:[#allocation5 + $0x388] sm:$0xf0]  ;;  %v2815_v54 = vor.u32 %v3342_v46, %v2812_v47 }
  0xab   :  { %1420 = vmatpush.bf16.msra.mxu1 %v2711_v55  ;;  %v1164_v55 = vsel %vm1159_vm0, %v990_v14, 0  ;;  %v2671_v58 = vor.u32 %v3306_v50, %v2668_v52  ;;  %v3362_v46 = vld [vmem:[#allocation8 + $0x24] sm:$0xf] }
  0xac   :  { %1398 = vmatmul.bf16.vlgmr.msra.gmra.mxu2 %v3750_v49  ;;  %1407 = vmatpush.bf16.msra.mxu0 %v2639_v37  ;;  %v2684_v49 = vld [vmem:[#allocation5 + $0x3a8] sm:$0xf0]  ;;  %v3340_v37 = vld [vmem:[#allocation5 + $0x494] sm:$0xf] }
  0xad   :  { %1446 = vmatpush.bf16.msrb.mxu2 %v2855_v53  ;;  %v2687_v27 = vor.u32 %v3310_v20, %v2684_v49  ;;  %v2735_v53 = vor.u32 %v3322_v40, %v2732_v51  ;;  %v2807_v61 = vor.u32 %v3340_v37, %v2804_v59  ;;  %v3363_v51 = vld [vmem:[#allocation8 + $0x24] sm:$0xf0] }
  0xae   :  { %1435 = vmatpush.bf16.msra.mxu3 %v2767_v3  ;;  %v2860_v3 = vld [vmem:[#allocation5 + $0x508] sm:$0xf0] }
  0xaf   :  { %1421 = vmatpush.bf16.msra.mxu1 %v2703_v1  ;;  %v2863_v1 = vor.u32 %v3354_v62, %v2860_v3  ;;  %v2876_v62 = vld [vmem:[#allocation8] sm:$0xf]  ;;  %v3359_v3 = vld [vmem:[#allocation8 + $0x4] sm:$0xf0] }
  0xb0   :  { %1408 = vmatpush.bf16.msra.mxu0 %v2631_v7  ;;  %v2933_v7 = vor.u32 %v3373_v6, %v2932_v5  ;;  %v2878_v5 = vld [vmem:[#allocation8 + $0x8] sm:$0xf0] }
  0xb1   :  { %1447 = vmatpush.bf16.msrb.mxu2 %v2847_v63  ;;  %v3338_v63 = vld [vmem:[#allocation5 + $0x484] sm:$0xf] }
  0xb2   :  { %1436 = vmatpush.bf16.msra.mxu3 %v2759_v12  ;;  %v2799_v4 = vor.u32 %v3338_v63, %v2796_v0  ;;  %v2926_v12 = vld [vmem:[#allocation8 + $0x68] sm:$0xf0]  ;;  %v3358_v63 = vld [vmem:[#allocation8 + $0x4] sm:$0xf] }
  0xb3   :  { %1422 = vmatpush.bf16.msra.mxu1 %v2695_v15  ;;  %v3369_v15 = vld [vmem:[#allocation8 + $0x54] sm:$0xf0]  ;;  %v2881_v6 = vor.u32 %v3358_v63, %v2878_v5 }
  0xb4   :  { %1409 = vmatpush.bf16.msra.mxu0 %v2623_v19  ;;  %v2917_v18 = vor.u32 %v3369_v15, %v2916_v13  ;;  %v3780_v19 = vld [vmem:[#allocation7] sm:$0x3] }
  0xb5   :  { %1448 = vmatpush.bf16.msrb.mxu2 %v2839_v2  ;;  %v2929_v2 = vor.u32 %v3370_v11, %v2926_v12  ;;  %v326_v21 = vperm.slane %v3780_v19, 0  ;;  %v327_v5 = vperm.slane %v3780_v19, 1 }
  0xb6   :  { %1437 = vmatpush.bf16.msra.mxu3 %v2751_v23  ;;  %v3367_v23 = vld [vmem:[#allocation8 + $0x44] sm:$0xf0] }
  0xb7   :  { %1423 = vmatpush.bf16.msra.mxu1 %v2687_v27  ;;  %v2909_v25 = vor.u32 %v3367_v23, %v2908_v22 }
  0xb8   :  { %1410 = vmatpush.bf16.msra.mxu0 %v2615_v31  ;;  %v3364_v31 = vld [vmem:[#allocation8 + $0x34] sm:$0xf] }
  0xb9   :  { %1449 = vmatpush.bf16.msrb.mxu2 %v2831_v24  ;;  %v3366_v24 = vld [vmem:[#allocation8 + $0x44] sm:$0xf] }
  0xba   :  { %1438 = vmatpush.bf16.msra.mxu3 %v2743_v38  ;;  %v2913_v27 = vor.u32 %v3366_v24, %v2910_v26  ;;  %v2905_v38 = vor.u32 %v3364_v31, %v2902_v36  ;;  %v2996_v36 = vld [vmem:[#allocation8 + $0xf0] sm:$0xf] }
  0xbb   :  { %1424 = vmatpush.bf16.msra.mxu1 %v2679_v44  ;;  %v2892_v44 = vld [vmem:[#allocation8 + $0x20] sm:$0xf] }
  0xbc   :  { %1411 = vmatpush.bf16.msra.mxu0 %v2607_v48  ;;  %v1175_v17 = vpop.f32.mrf.mxu0  ;;  %v2893_v47 = vor.u32 %v3363_v51, %v2892_v44  ;;  %v2894_v48 = vld [vmem:[#allocation8 + $0x28] sm:$0xf0] }
  0xbd   :  { %1450 = vmatpush.bf16.msrb.mxu2 %v2823_v39  ;;  %v1176_v28 = vadd.f32 %v1175_v17, %v326_v21  ;;  %v2897_v50 = vor.u32 %v3362_v46, %v2894_v48  ;;  %v2988_v46 = vld [vmem:[#allocation8 + $0xe0] sm:$0xf]  ;;  %v3386_v48 = vld [vmem:[#allocation8 + $0xe4] sm:$0xf] }
  0xbe   :  { %1439 = vmatpush.bf16.msra.mxu3 %v2735_v53  ;;  %v2884_v53 = vld [vmem:[#allocation8 + $0x10] sm:$0xf] }
  0xbf   :  { %1425 = vmatpush.bf16.msra.mxu1 %v2671_v58  ;;  %1412 = vmatmul.bf16.vlgmr.msra.gmra.mxu0 %v3746_v41  ;;  %v3372_v41 = vld [vmem:[#allocation8 + $0x74] sm:$0xf]  ;;  %v1189_v49 = vpop.f32.mrf.mxu1 }
  0xc0   :  { %1465 = vmatpush.bf16.msrb.mxu0 %v1164_v55  ;;  %v2937_v10 = vor.u32 %v3372_v41, %v2934_v8  ;;  %v1190_v14 = vadd.f32 %v1189_v49, %v1176_v28  ;;  %v3360_v55 = vld [vmem:[#allocation8 + $0x14] sm:$0xf] }
  0xc1   :  { %1451 = vmatpush.bf16.msrb.mxu2 %v2815_v54  ;;  %1440 = vmatmul.bf16.vlgmr.msra.gmra.mxu3 %v3760_v33  ;;  %v3371_v33 = vld [vmem:[#allocation8 + $0x64] sm:$0xf0]  ;;  %v3361_v54 = vld [vmem:[#allocation8 + $0x14] sm:$0xf0]  ;;  %v2889_v58 = vor.u32 %v3360_v55, %v2886_v57  ;;  %v2980_v55 = vld [vmem:[#allocation8 + $0xd0] sm:$0xf] }
  0xc2   :  { %1426 = vmatmul.bf16.vlgmr.msra.gmra.mxu1 %v3748_v45  ;;  %v2925_v45 = vor.u32 %v3371_v33, %v2924_v9  ;;  %v2885_v56 = vor.u32 %v3361_v54, %v2884_v53  ;;  %v3384_v57 = vld [vmem:[#allocation8 + $0xd4] sm:$0xf] }
  0xc3   :  { %1686 = vmatpush.bf16.msrb.mxu1 %v2933_v7 }
  0xc4   :  { %1466 = vmatpush.bf16.msrb.mxu0 %v2871_v60  ;;  %v1177_v32 = vpop.f32.mrf.mxu0  ;;  %v1217_v39 = vpop.f32.mrf.mxu3 }
  0xc5   :  { %1452 = vmatpush.bf16.msrb.mxu2 %v2807_v61  ;;  %v1178_v61 = vadd.f32 %v1177_v32, %v326_v21 }
  0xc7   :  { %1687 = vmatpush.bf16.msrb.mxu1 %v2925_v45  ;;  %v1191_v40 = vpop.f32.mrf.mxu1 }
  0xc8   :  { %1467 = vmatpush.bf16.msrb.mxu0 %v2863_v1  ;;  %v1192_v41 = vadd.f32 %v1191_v40, %v1178_v61  ;;  %v3383_v61 = vld [vmem:[#allocation8 + $0xc4] sm:$0xf0] }
  0xc9   :  { %1453 = vmatpush.bf16.msrb.mxu2 %v2799_v4  ;;  %v2877_v4 = vor.u32 %v3359_v3, %v2876_v62  ;;  %v3382_v62 = vld [vmem:[#allocation8 + $0xc4] sm:$0xf] }
  0xcb   :  { %1688 = vmatpush.bf16.msrb.mxu1 %v2917_v18 }
  0xcc   :  { %1454 = vmatmul.bf16.vlgmr.msrb.gmra.mxu2 %v3762_v42  ;;  %1714 = vmatpush.bf16.msra.mxu0 %v2937_v10  ;;  %v3368_v42 = vld [vmem:[#allocation8 + $0x54] sm:$0xf]  ;;  %v1219_v0 = vpop.f32.mrf.mxu3 }
  0xcd   :  { %v2921_v20 = vor.u32 %v3368_v42, %v2918_v16 }
  0xcf   :  { %2873 = vmatmul.msk.bf16.vlgmr.msrb.gmra.mxu0 %vm1155_vm1, %v3756_v43  ;;  %v1203_v43 = vpop.f32.mrf.mxu2  ;;  %1689 = vmatpush.bf16.msrb.mxu1 %v2909_v25 }
  0xd0   :  { %1715 = vmatpush.bf16.msra.mxu0 %v2929_v2  ;;  %v1204_v52 = vadd.f32 %v1203_v43, %v1190_v14  ;;  %v2998_v14 = vld [vmem:[#allocation8 + $0xf8] sm:$0xf0] }
  0xd2   :  { %v1218_v60 = vadd.f32 %v1217_v39, %v1204_v52  ;;  %v3388_v39 = vld [vmem:[#allocation8 + $0xf4] sm:$0xf]  ;;  %v2990_v52 = vld [vmem:[#allocation8 + $0xe8] sm:$0xf0] }
  0xd3   :  { %1690 = vmatpush.bf16.msrb.mxu1 %v2901_v35  ;;  %v3001_v44 = vor.u32 %v3388_v39, %v2998_v14  ;;  %v2993_v53 = vor.u32 %v3386_v48, %v2990_v52 }
  0xd4   :  { %1716 = vmatpush.bf16.msra.mxu0 %v2921_v20 }
  0xd5   :  { %1728 = vmatpush.bf16.msra.mxu2 %v3001_v44 }
  0xd7   :  { %v1205_v34 = vpop.f32.mrf.mxu2  ;;  %1691 = vmatpush.bf16.msrb.mxu1 %v2893_v47  ;;  %v3387_v47 = vld [vmem:[#allocation8 + $0xe4] sm:$0xf0] }
  0xd8   :  { %1717 = vmatpush.bf16.msra.mxu0 %v2913_v27  ;;  %v1206_v8 = vadd.f32 %v1205_v34, %v1192_v41  ;;  %v3381_v41 = vld [vmem:[#allocation8 + $0xb4] sm:$0xf0] }
  0xd9   :  { %1729 = vmatpush.bf16.msra.mxu2 %v2993_v53 }
  0xda   :  { %v1220_v45 = vadd.f32 %v1219_v0, %v1206_v8 }
  0xdb   :  { %1692 = vmatpush.bf16.msrb.mxu1 %v2885_v56  ;;  %v3385_v56 = vld [vmem:[#allocation8 + $0xd4] sm:$0xf0] }
  0xdc   :  { %1718 = vmatpush.bf16.msra.mxu0 %v2905_v38  ;;  %v1231_v37 = vpop.f32.mrf.mxu0  ;;  %v3389_v38 = vld [vmem:[#allocation8 + $0xf4] sm:$0xf0] }
  0xdd   :  { %v1232_v7 = vadd.f32 %v1231_v37, %v1218_v60  ;;  %v2997_v40 = vor.u32 %v3389_v38, %v2996_v36  ;;  %v2982_v37 = vld [vmem:[#allocation8 + $0xd8] sm:$0xf0]  ;;  %v2972_v60 = vld [vmem:[#allocation8 + $0xc0] sm:$0xf] }
  0xde   :  { %v2973_v0 = vor.u32 %v3383_v61, %v2972_v60 }
  0xdf   :  { %v1245_v1 = vpop.f32.mrf.mxu1  ;;  %1693 = vmatpush.bf16.msrb.mxu1 %v2877_v4  ;;  %1700 = vmatpush.bf16.msrb.mxu3 %v2997_v40 }
  0xe0   :  { %1719 = vmatpush.bf16.msra.mxu0 %v2897_v50  ;;  %v1246_v9 = vadd.f32 %v1245_v1, %v1232_v7  ;;  %v2989_v50 = vor.u32 %v3387_v47, %v2988_v46  ;;  %v2974_v1 = vld [vmem:[#allocation8 + $0xc8] sm:$0xf0]  ;;  %v3380_v7 = vld [vmem:[#allocation8 + $0xb4] sm:$0xf] }
  0xe1   :  { %v2977_v4 = vor.u32 %v3382_v62, %v2974_v1 }
  0xe3   :  { %v1259_v59 = vpop.f32.mrf.mxu2  ;;  %1701 = vmatpush.bf16.msrb.mxu3 %v2989_v50 }
  0xe4   :  { %1720 = vmatpush.bf16.msra.mxu0 %v2889_v58  ;;  %v1233_v33 = vpop.f32.mrf.mxu0  ;;  %v1273_v11 = vpop.f32.mrf.mxu3  ;;  %v1260_v2 = vadd.f32 %v1259_v59, %v1246_v9  ;;  %v2981_v58 = vor.u32 %v3385_v56, %v2980_v55  ;;  %v2985_v59 = vor.u32 %v3384_v57, %v2982_v37  ;;  %v2966_v9 = vld [vmem:[#allocation8 + $0xb8] sm:$0xf0] }
  0xe5   :  { %v1234_v13 = vadd.f32 %v1233_v33, %v1220_v45  ;;  %v3379_v45 = vld [vmem:[#allocation8 + $0xa4] sm:$0xf0] }
  0xe6   :  { %v1274_v15 = vadd.f32 %v1273_v11, %v1260_v2  ;;  %1730 = vmatpush.bf16.msra.mxu2 %v2985_v59  ;;  %v3378_v2 = vld [vmem:[#allocation8 + $0xa4] sm:$0xf] }
  0xe7   :  { %v1247_v12 = vpop.f32.mrf.mxu1  ;;  %1702 = vmatpush.bf16.msrb.mxu3 %v2981_v58 }
  0xe8   :  { %1721 = vmatpush.bf16.msra.mxu0 %v2881_v6  ;;  %v1248_v17 = vadd.f32 %v1247_v12, %v1234_v13  ;;  %v2964_v6 = vld [vmem:[#allocation8 + $0xb0] sm:$0xf]  ;;  %v2956_v12 = vld [vmem:[#allocation8 + $0xa0] sm:$0xf] }
  0xe9   :  { %v2965_v8 = vor.u32 %v3381_v41, %v2964_v6 }
  0xea   :  { %1731 = vmatpush.bf16.msra.mxu2 %v2977_v4 }
  0xeb   :  { %v1261_v10 = vpop.f32.mrf.mxu2  ;;  %1703 = vmatpush.bf16.msrb.mxu3 %v2973_v0 }
  0xec   :  { %v1262_v20 = vadd.f32 %v1261_v10, %v1248_v17  ;;  %v1275_v49 = vpop.f32.mrf.mxu3  ;;  %v2969_v10 = vor.u32 %v3380_v7, %v2966_v9 }
  0xee   :  { %v1276_v22 = vadd.f32 %v1275_v49, %v1262_v20  ;;  %1732 = vmatpush.bf16.msra.mxu2 %v2969_v10  ;;  %v3377_v20 = vld [vmem:[#allocation8 + $0x94] sm:$0xf0]  ;;  %v3376_v49 = vld [vmem:[#allocation8 + $0x94] sm:$0xf] }
  0xef   :  { %1704 = vmatpush.bf16.msrb.mxu3 %v2965_v8  ;;  %v3405_v10 = vld [vmem:[#allocation10 + $0x74] sm:$0xf0] }
  0xf3   :  { %v1315_v16 = vpop.f32.mrf.mxu2 }
  0xfb   :  { %v1317_v27 = vpop.f32.mrf.mxu2 }
  0xfc   :  { %v1287_v42 = vpop.f32.mrf.mxu0 }
  0xfd   :  { %v1288_v43 = vadd.f32 %v1287_v42, %v1274_v15  ;;  %v2957_v15 = vor.u32 %v3379_v45, %v2956_v12  ;;  %v2958_v42 = vld [vmem:[#allocation8 + $0xa8] sm:$0xf0]  ;;  %v3421_v45 = vld [vmem:[#allocation10 + $0xf4] sm:$0xf0] }
  0xff   :  { %v1301_v18 = vpop.f32.mrf.mxu1  ;;  %1705 = vmatpush.bf16.msrb.mxu3 %v2957_v15 }
 0x100   :  { %v1302_v21 = vadd.f32 %v1301_v18, %v1288_v43  ;;  %v2948_v18 = vld [vmem:[#allocation8 + $0x90] sm:$0xf] }
 0x102   :  { %v1316_v24 = vadd.f32 %v1315_v16, %v1302_v21  ;;  %v2961_v16 = vor.u32 %v3378_v2, %v2958_v42  ;;  %v2949_v21 = vor.u32 %v3377_v20, %v2948_v18  ;;  %v3404_v2 = vld [vmem:[#allocation10 + $0x74] sm:$0xf]  ;;  %v3403_v18 = vld [vmem:[#allocation10 + $0x64] sm:$0xf0]  ;;  %v3116_v20 = vld [vmem:[#allocation10 + $0xe0] sm:$0xf] }
 0x104   :  { %v1289_v23 = vpop.f32.mrf.mxu0  ;;  %v1478_v29 = vmul.f32 0.01, %v1316_v24  ;;  %vm1474_vm2 = vcmp.gt.f32.partialorder %v1316_v24, 0.0  ;;  %v1329_v51 = vpop.f32.mrf.mxu3  ;;  %1733 = vmatpush.bf16.msra.mxu2 %v2961_v16  ;;  %1706 = vmatpush.bf16.msrb.mxu3 %v2949_v21  ;;  %v3420_v16 = vld [vmem:[#allocation10 + $0xf4] sm:$0xf] }
 0x105   :  { %v1290_v25 = vadd.f32 %v1289_v23, %v1276_v22  ;;  %v1330_v11 = vadd.f32 %v1329_v51, %v327_v5  ;;  %v2950_v22 = vld [vmem:[#allocation8 + $0x98] sm:$0xf0] }
 0x106   :  { %v1482_v32 = vsel %vm1474_vm2, %v1316_v24, %v1478_v29  ;;  %v2953_v23 = vor.u32 %v3376_v49, %v2950_v22  ;;  %v3374_v29 = vld [vmem:[#allocation8 + $0x84] sm:$0xf]  ;;  %v3419_v49 = vld [vmem:[#allocation10 + $0xe4] sm:$0xf0] }
 0x107   :  { %v1303_v26 = vpop.f32.mrf.mxu1  ;;  %v3117_v22 = vor.u32 %v3419_v49, %v3116_v20  ;;  %v3014_v20 = vld [vmem:[#allocation10 + $0x18] sm:$0xf0] }
 0x108   :  { %v1304_v28 = vadd.f32 %v1303_v26, %v1290_v25  ;;  %1734 = vmatpush.bf16.msra.mxu2 %v2953_v23  ;;  %v3402_v23 = vld [vmem:[#allocation10 + $0x64] sm:$0xf] }
 0x10a   :  { %v1318_v30 = vadd.f32 %v1317_v27, %v1304_v28  ;;  %v2940_v27 = vld [vmem:[#allocation8 + $0x80] sm:$0xf]  ;;  %v3375_v28 = vld [vmem:[#allocation8 + $0x84] sm:$0xf0] }
 0x10c   :  { %vm1476_vm3 = vcmp.gt.f32.partialorder %v1318_v30, 0.0  ;;  %v1480_v31 = vmul.f32 0.01, %v1318_v30  ;;  %v1331_v3 = vpop.f32.mrf.mxu3 }
 0x10d   :  { %v1332_v24 = vadd.f32 %v1331_v3, %v327_v5 }
 0x10e   :  { %v1484_v34 = vsel %vm1476_vm3, %v1318_v30, %v1480_v31  ;;  %v2941_v30 = vor.u32 %v3375_v28, %v2940_v27  ;;  %v2942_v31 = vld [vmem:[#allocation8 + $0x88] sm:$0xf0]  ;;  %v3044_v28 = vld [vmem:[#allocation10 + $0x50] sm:$0xf] }
 0x10f   :  { %v1486_v35 = vpack.c.bf16 %v1484_v34, %v1482_v32  ;;  %v1343_v54 = vpop.f32.mrf.mxu2  ;;  %v2945_v32 = vor.u32 %v3374_v29, %v2942_v31  ;;  %v3118_v27 = vld [vmem:[#allocation10 + $0xe8] sm:$0xf0]  ;;  %v3401_v29 = vld [vmem:[#allocation10 + $0x54] sm:$0xf0]  ;;  %v3108_v31 = vld [vmem:[#allocation10 + $0xd0] sm:$0xf] }
 0x110   :  { %v1344_v43 = vadd.f32 %v1343_v54, %v1330_v11  ;;  %1707 = vmatpush.bf16.msrb.mxu3 %v2941_v30  ;;  %v3124_v11 = vld [vmem:[#allocation10 + $0xf0] sm:$0xf] }
 0x111   :  { %1694 = vmatmul.bf16.vlgmr.msrb.gmra.mxu1 %v1486_v35  ;;  %1722 = vmatmul.bf16.vlgmr.msra.gmra.mxu0 %v1486_v35  ;;  %v3125_v15 = vor.u32 %v3421_v45, %v3124_v11  ;;  %v3022_v11 = vld [vmem:[#allocation10 + $0x28] sm:$0xf0] }
 0x112   :  { %1735 = vmatpush.bf16.msra.mxu2 %v2945_v32  ;;  %v3417_v32 = vld [vmem:[#allocation10 + $0xd4] sm:$0xf0] }
 0x114   :  { %1968 = vmatpush.bf16.msra.mxu3 %v3125_v15 }
 0x117   :  { %v1345_v33 = vpop.f32.mrf.mxu2 }
 0x118   :  { %v1346_v36 = vadd.f32 %v1345_v33, %v1332_v24  ;;  %v3060_v33 = vld [vmem:[#allocation10 + $0x70] sm:$0xf]  ;;  %v3054_v24 = vld [vmem:[#allocation10 + $0x68] sm:$0xf0]  ;;  %1969 = vmatpush.bf16.msra.mxu3 %v3117_v22  ;;  %v3408_v22 = vld [vmem:[#allocation10 + $0x94] sm:$0xf] }
 0x119   :  { %v3061_v12 = vor.u32 %v3405_v10, %v3060_v33  ;;  %v3411_v33 = vld [vmem:[#allocation10 + $0xa4] sm:$0xf0]  ;;  %v3394_v10 = vld [vmem:[#allocation10 + $0x24] sm:$0xf] }
 0x11a   :  { %v3025_v45 = vor.u32 %v3394_v10, %v3022_v11 }
 0x11b   :  { %1954 = vmatpush.bf16.msra.mxu1 %v3061_v12 }
 0x11c   :  { %v1357_v63 = vpop.f32.mrf.mxu0 }
 0x11d   :  { %v1358_v25 = vadd.f32 %v1357_v63, %v1344_v43 }
 0x11f   :  { %v1371_v13 = vpop.f32.mrf.mxu1 }
 0x120   :  { %v1372_v38 = vadd.f32 %v1371_v13, %v1358_v25  ;;  %v3062_v13 = vld [vmem:[#allocation10 + $0x78] sm:$0xf0]  ;;  %v3418_v25 = vld [vmem:[#allocation10 + $0xe4] sm:$0xf] }
 0x121   :  { %v3065_v42 = vor.u32 %v3404_v2, %v3062_v13  ;;  %v3121_v30 = vor.u32 %v3418_v25, %v3118_v27  ;;  %v3410_v2 = vld [vmem:[#allocation10 + $0xa4] sm:$0xf]  ;;  %v3086_v13 = vld [vmem:[#allocation10 + $0xa8] sm:$0xf0]  ;;  %v3004_v25 = vld [vmem:[#allocation10] sm:$0xf] }
 0x122   :  { %v3089_v15 = vor.u32 %v3410_v2, %v3086_v13  ;;  %v3068_v27 = vld [vmem:[#allocation10 + $0x80] sm:$0xf]  ;;  %v3425_v2 = vld [vmem:[#allocation11 + $0x18] sm:$0xff] }
 0x123   :  { %1982 = vmatpush.bf16.msrb.mxu0 %v3065_v42  ;;  %v3012_v42 = vld [vmem:[#allocation10 + $0x10] sm:$0xf]  ;;  %v3433_v13 = vld [vmem:[#allocation11 + $0x58] sm:$0xff] }
 0x124   :  { %v1385_v19 = vpop.f32.mrf.mxu3  ;;  %v1359_v17 = vpop.f32.mrf.mxu0 }
 0x125   :  { %v1386_v40 = vadd.f32 %v1385_v19, %v1372_v38  ;;  %v1360_v14 = vadd.f32 %v1359_v17, %v1346_v36  ;;  %v3126_v19 = vld [vmem:[#allocation10 + $0xf8] sm:$0xf0]  ;;  %v3052_v17 = vld [vmem:[#allocation10 + $0x60] sm:$0xf]  ;;  %v3416_v38 = vld [vmem:[#allocation10 + $0xd4] sm:$0xf] }
 0x126   :  { %v3129_v43 = vor.u32 %v3420_v16, %v3126_v19  ;;  %v3053_v21 = vor.u32 %v3403_v18, %v3052_v17  ;;  %v3046_v36 = vld [vmem:[#allocation10 + $0x58] sm:$0xf0]  ;;  %v3393_v16 = vld [vmem:[#allocation10 + $0x14] sm:$0xf0]  ;;  %v3076_v19 = vld [vmem:[#allocation10 + $0x90] sm:$0xf] }
 0x127   :  { %v1373_v34 = vpop.f32.mrf.mxu1  ;;  %v3013_v17 = vor.u32 %v3393_v16, %v3012_v42  ;;  %v3392_v18 = vld [vmem:[#allocation10 + $0x14] sm:$0xf]  ;;  %v3423_v16 = vld [vmem:[#allocation11 + $0x8] sm:$0xff] }
 0x128   :  { %v1374_v48 = vadd.f32 %v1373_v34, %v1360_v14  ;;  %1996 = vmatpush.bf16.msrb.mxu2 %v3129_v43  ;;  %v3400_v34 = vld [vmem:[#allocation10 + $0x54] sm:$0xf]  ;;  %1955 = vmatpush.bf16.msra.mxu1 %v3053_v21  ;;  %v3409_v43 = vld [vmem:[#allocation10 + $0x94] sm:$0xf0]  ;;  %v3017_v21 = vor.u32 %v3392_v18, %v3014_v20 }
 0x129   :  { %v3049_v14 = vor.u32 %v3400_v34, %v3046_v36  ;;  %v3077_v49 = vor.u32 %v3409_v43, %v3076_v19  ;;  %v3070_v36 = vld [vmem:[#allocation10 + $0x88] sm:$0xf0]  ;;  %v3432_v42 = vld [vmem:[#allocation11 + $0x50] sm:$0xff]  ;;  %v3430_v43 = vld [vmem:[#allocation11 + $0x40] sm:$0xff] }
 0x12a   :  { %v3431_v19 = vld [vmem:[#allocation11 + $0x48] sm:$0xff] }
 0x12c   :  { %v1387_v39 = vpop.f32.mrf.mxu3  ;;  %1997 = vmatpush.bf16.msrb.mxu2 %v3121_v30  ;;  %v3390_v30 = vld [vmem:[#allocation10 + $0x4] sm:$0xf] }
 0x12d   :  { %v1388_v53 = vadd.f32 %v1387_v39, %v1374_v48  ;;  %v3110_v39 = vld [vmem:[#allocation10 + $0xd8] sm:$0xf0]  ;;  %v3415_v48 = vld [vmem:[#allocation10 + $0xc4] sm:$0xf0] }
 0x12f   :  { %v1399_v26 = vpop.f32.mrf.mxu2 }
 0x130   :  { %v1400_v47 = vadd.f32 %v1399_v26, %v1386_v40  ;;  %v3057_v26 = vor.u32 %v3402_v23, %v3054_v24  ;;  %v3109_v40 = vor.u32 %v3417_v32, %v3108_v31  ;;  %v3078_v23 = vld [vmem:[#allocation10 + $0x98] sm:$0xf0]  ;;  %v3006_v31 = vld [vmem:[#allocation10 + $0x8] sm:$0xf0] }
 0x131   :  { %v3081_v24 = vor.u32 %v3408_v22, %v3078_v23  ;;  %v3009_v34 = vor.u32 %v3390_v30, %v3006_v31 }
 0x132   :  { %1983 = vmatpush.bf16.msrb.mxu0 %v3057_v26  ;;  %1970 = vmatpush.bf16.msra.mxu3 %v3109_v40  ;;  %v3391_v26 = vld [vmem:[#allocation10 + $0x4] sm:$0xf0]  ;;  %v3437_v40 = vld [vmem:[#allocation11 + $0x78] sm:$0xff] }
 0x136   :  { %1984 = vmatpush.bf16.msrb.mxu0 %v3049_v14  ;;  %v3428_v14 = vld [vmem:[#allocation11 + $0x30] sm:$0xff] }
 0x137   :  { %v1401_v44 = vpop.f32.mrf.mxu2 }
 0x138   :  { %v1402_v54 = vadd.f32 %v1401_v44, %v1388_v53  ;;  %v3036_v44 = vld [vmem:[#allocation10 + $0x40] sm:$0xf]  ;;  %v3414_v53 = vld [vmem:[#allocation10 + $0xc4] sm:$0xf] }
 0x13c   :  { %v1413_v35 = vpop.f32.mrf.mxu0 }
 0x13d   :  { %v1414_v52 = vadd.f32 %v1413_v35, %v1400_v47  ;;  %v3045_v35 = vor.u32 %v3401_v29, %v3044_v28  ;;  %v3113_v47 = vor.u32 %v3416_v38, %v3110_v39  ;;  %v3005_v28 = vor.u32 %v3391_v26, %v3004_v25  ;;  %v3407_v29 = vld [vmem:[#allocation10 + $0x84] sm:$0xf0]  ;;  %v3429_v39 = vld [vmem:[#allocation11 + $0x38] sm:$0xff] }
 0x13e   :  { %v3069_v32 = vor.u32 %v3407_v29, %v3068_v27 }
 0x13f   :  { %v1427_v51 = vpop.f32.mrf.mxu1  ;;  %1956 = vmatpush.bf16.msra.mxu1 %v3045_v35  ;;  %1998 = vmatpush.bf16.msrb.mxu2 %v3113_v47  ;;  %v3406_v35 = vld [vmem:[#allocation10 + $0x84] sm:$0xf] }
 0x140   :  { %v1428_v55 = vadd.f32 %v1427_v51, %v1414_v52  ;;  %v3399_v51 = vld [vmem:[#allocation10 + $0x44] sm:$0xf0]  ;;  %v3038_v52 = vld [vmem:[#allocation10 + $0x48] sm:$0xf0]  ;;  %v3073_v38 = vor.u32 %v3406_v35, %v3070_v36 }
 0x144   :  { %v1415_v46 = vpop.f32.mrf.mxu0  ;;  %v1441_v50 = vpop.f32.mrf.mxu3 }
 0x145   :  { %v1442_v57 = vadd.f32 %v1441_v50, %v1428_v55  ;;  %v1416_v58 = vadd.f32 %v1415_v46, %v1402_v54  ;;  %v3100_v46 = vld [vmem:[#allocation10 + $0xc0] sm:$0xf]  ;;  %v3398_v50 = vld [vmem:[#allocation10 + $0x44] sm:$0xf]  ;;  %v3102_v54 = vld [vmem:[#allocation10 + $0xc8] sm:$0xf0]  ;;  %v3037_v55 = vor.u32 %v3399_v51, %v3036_v44 }
 0x146   :  { %v3436_v44 = vld [vmem:[#allocation11 + $0x70] sm:$0xff]  ;;  %v3427_v51 = vld [vmem:[#allocation11 + $0x28] sm:$0xff] }
 0x147   :  { %v1429_v59 = vpop.f32.mrf.mxu1  ;;  %1957 = vmatpush.bf16.msra.mxu1 %v3037_v55 }
 0x148   :  { %v1430_v62 = vadd.f32 %v1429_v59, %v1416_v58  ;;  %v3105_v58 = vor.u32 %v3414_v53, %v3102_v54  ;;  %v3397_v59 = vld [vmem:[#allocation10 + $0x34] sm:$0xf0] }
 0x14a   :  { %1999 = vmatpush.bf16.msrb.mxu2 %v3105_v58 }
 0x14c   :  { %v1469_v37 = vpop.f32.mrf.mxu0  ;;  %v1443_v61 = vpop.f32.mrf.mxu3 }
 0x14d   :  { %v1444_v3 = vadd.f32 %v1443_v61, %v1430_v62  ;;  %v3413_v62 = vld [vmem:[#allocation10 + $0xb4] sm:$0xf0] }
 0x14f   :  { %v1455_v56 = vpop.f32.mrf.mxu2 }
 0x150   :  { %v1456_v60 = vadd.f32 %v1455_v56, %v1442_v57  ;;  %v3101_v56 = vor.u32 %v3415_v48, %v3100_v46  ;;  %v3041_v57 = vor.u32 %v3398_v50, %v3038_v52  ;;  %v3435_v46 = vld [vmem:[#allocation11 + $0x68] sm:$0xff]  ;;  %v1520_v50 = vld [vmem:[%s3803_s4] sm:$0x3] }
 0x151   :  { %v1522_v52 = vperm.slane %v1520_v50, 0  ;;  %v1523_v53 = vperm.slane %v1520_v50, 1 }
 0x152   :  { %v1470_v63 = vadd.f32 %v1469_v37, %v1456_v60  ;;  %1971 = vmatpush.bf16.msra.mxu3 %v3101_v56  ;;  %1985 = vmatpush.bf16.msrb.mxu0 %v3041_v57  ;;  %v3028_v37 = vld [vmem:[#allocation10 + $0x30] sm:$0xf] }
 0x153   :  { %v3092_v60 = vld [vmem:[#allocation10 + $0xb0] sm:$0xf]  ;;  %v3029_v61 = vor.u32 %v3397_v59, %v3028_v37 }
 0x154   :  { %v1471_v4 = vpop.f32.mrf.mxu0  ;;  %v1479_v5 = vmul.f32 0.01, %v1470_v63  ;;  %vm1475_vm4 = vcmp.gt.f32.partialorder %v1470_v63, 0.0 }
 0x155   :  { %1958 = vmatpush.bf16.msra.mxu1 %v3029_v61 }
 0x156   :  { %v1483_v7 = vsel %vm1475_vm4, %v1470_v63, %v1479_v5  ;;  %v3030_v63 = vld [vmem:[#allocation10 + $0x38] sm:$0xf0] }
 0x157   :  { %v1457_v0 = vpop.f32.mrf.mxu2  ;;  %v3094_v5 = vld [vmem:[#allocation10 + $0xb8] sm:$0xf0] }
 0x158   :  { %v1458_v1 = vadd.f32 %v1457_v0, %v1444_v3  ;;  %v3396_v3 = vld [vmem:[#allocation10 + $0x34] sm:$0xf]  ;;  %v3093_v0 = vor.u32 %v3413_v62, %v3092_v60 }
 0x15a   :  { %v1472_v6 = vadd.f32 %v1471_v4, %v1458_v1  ;;  %v3033_v1 = vor.u32 %v3396_v3, %v3030_v63  ;;  %v3412_v4 = vld [vmem:[#allocation10 + $0xb4] sm:$0xf]  ;;  %1972 = vmatpush.bf16.msra.mxu3 %v3093_v0 }
 0x15c   :  { %vm1477_vm5 = vcmp.gt.f32.partialorder %v1472_v6, 0.0  ;;  %v1481_v41 = vmul.f32 0.01, %v1472_v6  ;;  %1986 = vmatpush.bf16.msrb.mxu0 %v3033_v1 }
 0x15e   :  { %v1485_v8 = vsel %vm1477_vm5, %v1472_v6, %v1481_v41  ;;  %v3097_v6 = vor.u32 %v3412_v4, %v3094_v5  ;;  %v3020_v41 = vld [vmem:[#allocation10 + $0x20] sm:$0xf] }
 0x15f   :  { %v1487_v9 = vpack.c.bf16 %v1485_v8, %v1483_v7  ;;  %v3395_v7 = vld [vmem:[#allocation10 + $0x24] sm:$0xf0]  ;;  %v3084_v8 = vld [vmem:[#allocation10 + $0xa0] sm:$0xf] }
 0x160   :  { %2000 = vmatpush.bf16.msrb.mxu2 %v3097_v6  ;;  %v3085_v12 = vor.u32 %v3411_v33, %v3084_v8  ;;  %1987 = vmatpush.bf16.msrb.mxu0 %v3025_v45  ;;  %v3434_v45 = vld [vmem:[#allocation11 + $0x60] sm:$0xff] }
 0x161   :  { %1708 = vmatmul.bf16.vlgmr.msrb.gmra.mxu3 %v1487_v9  ;;  %1736 = vmatmul.bf16.vlgmr.msra.gmra.mxu2 %v1487_v9  ;;  %v3021_v9 = vor.u32 %v3395_v7, %v3020_v41 }
 0x162   :  { %1973 = vmatpush.bf16.msra.mxu3 %v3085_v12  ;;  %v3426_v12 = vld [vmem:[#allocation11 + $0x20] sm:$0xff] }
 0x163   :  { %1959 = vmatpush.bf16.msra.mxu1 %v3021_v9 }
 0x164   :  { %2001 = vmatpush.bf16.msrb.mxu2 %v3089_v15  ;;  %1988 = vmatpush.bf16.msrb.mxu0 %v3017_v21  ;;  %v3424_v15 = vld [vmem:[#allocation11 + $0x10] sm:$0xff] }
 0x166   :  { %1974 = vmatpush.bf16.msra.mxu3 %v3077_v49  ;;  %v1788_v49 = vld [vmem:[%s3805_s6] sm:$0x3] }
 0x167   :  { %1960 = vmatpush.bf16.msra.mxu1 %v3013_v17  ;;  %v3422_v17 = vld [vmem:[#allocation11] sm:$0xff]  ;;  %v1790_v21 = vperm.slane %v1788_v49, 0  ;;  %v1791_v22 = vperm.slane %v1788_v49, 1 }
 0x168   :  { %2002 = vmatpush.bf16.msrb.mxu2 %v3081_v24  ;;  %1989 = vmatpush.bf16.msrb.mxu0 %v3009_v34 }
 0x16a   :  { %1975 = vmatpush.bf16.msra.mxu3 %v3069_v32 }
 0x16b   :  { %1961 = vmatpush.bf16.msra.mxu1 %v3005_v28 }
 0x16c   :  { %2003 = vmatpush.bf16.msrb.mxu2 %v3073_v38 }
 0x16e   :  { %2170 = vmatpush.bf16.msrb.mxu3 %v3437_v40 }
 0x16f   :  { %2156 = vmatpush.bf16.msrb.mxu1 %v3429_v39 }
 0x172   :  { %2171 = vmatpush.bf16.msrb.mxu3 %v3436_v44 }
 0x173   :  { %2157 = vmatpush.bf16.msrb.mxu1 %v3428_v14 }
 0x176   :  { %2172 = vmatpush.bf16.msrb.mxu3 %v3435_v46 }
 0x177   :  { %2158 = vmatpush.bf16.msrb.mxu1 %v3427_v51 }
 0x17a   :  { %2173 = vmatpush.bf16.msrb.mxu3 %v3434_v45 }
 0x17b   :  { %2159 = vmatpush.bf16.msrb.mxu1 %v3426_v12 }
 0x17e   :  { %2174 = vmatpush.bf16.msrb.mxu3 %v3433_v13 }
 0x17f   :  { %2160 = vmatpush.bf16.msrb.mxu1 %v3425_v2 }
 0x182   :  { %2175 = vmatpush.bf16.msrb.mxu3 %v3432_v42 }
 0x183   :  { %2161 = vmatpush.bf16.msrb.mxu1 %v3424_v15 }
 0x186   :  { %2176 = vmatpush.bf16.msrb.mxu3 %v3431_v19 }
 0x187   :  { %2162 = vmatpush.bf16.msrb.mxu1 %v3423_v16 }
 0x18a   :  { %2177 = vmatpush.bf16.msrb.mxu3 %v3430_v43 }
 0x18b   :  { %2163 = vmatpush.bf16.msrb.mxu1 %v3422_v17 }
 0x18e   :  { %v1695_v47 = vpop.f32.mrf.mxu1  ;;  %v1723_v48 = vpop.f32.mrf.mxu0 }
 0x18f   :  { %v1696_v56 = vadd.f32 %v1695_v47, %v1522_v52  ;;  %v1724_v57 = vadd.f32 %v1723_v48, %v1523_v53 }
 0x196   :  { %v1697_v58 = vpop.f32.mrf.mxu1  ;;  %v1725_v37 = vpop.f32.mrf.mxu0 }
 0x197   :  { %v1698_v61 = vadd.f32 %v1697_v58, %v1522_v52  ;;  %v1726_v62 = vadd.f32 %v1725_v37, %v1523_v53 }
 0x1e4   :  { %v1709_v54 = vpop.f32.mrf.mxu3  ;;  %v1737_v55 = vpop.f32.mrf.mxu2 }
 0x1e5   :  { %v1710_v59 = vadd.f32 %v1709_v54, %v1696_v56  ;;  %v1738_v60 = vadd.f32 %v1737_v55, %v1724_v57  ;;  %v3456_v54 = vld [vmem:[%s3807_s8] ss:$0 sm:$0xff] }
 0x1e7   :  { %v1746_v0 = vmul.f32 0.01, %v1710_v59  ;;  %v1747_v1 = vmul.f32 0.01, %v1738_v60  ;;  %vm1742_vm6 = vcmp.gt.f32.partialorder %v1710_v59, 0.0  ;;  %vm1743_vm7 = vcmp.gt.f32.partialorder %v1738_v60, 0.0 }
 0x1e9   :  { %v1750_v7 = vsel %vm1742_vm6, %v1710_v59, %v1746_v0  ;;  %v1751_v8 = vsel %vm1743_vm7, %v1738_v60, %v1747_v1 }
 0x1ec   :  { %v1711_v3 = vpop.f32.mrf.mxu3  ;;  %v1739_v63 = vpop.f32.mrf.mxu2 }
 0x1ed   :  { %v1712_v4 = vadd.f32 %v1711_v3, %v1698_v61  ;;  %v1740_v5 = vadd.f32 %v1739_v63, %v1726_v62 }
 0x1ef   :  { %vm1744_vm8 = vcmp.gt.f32.partialorder %v1712_v4, 0.0  ;;  %v1748_v6 = vmul.f32 0.01, %v1712_v4  ;;  %vm1745_vm9 = vcmp.gt.f32.partialorder %v1740_v5, 0.0  ;;  %v1749_v41 = vmul.f32 0.01, %v1740_v5 }
 0x1f1   :  { %v1752_v9 = vsel %vm1744_vm8, %v1712_v4, %v1748_v6  ;;  %v1753_v33 = vsel %vm1745_vm9, %v1740_v5, %v1749_v41 }
 0x1f2   :  { %v1754_v10 = vpack.c.bf16 %v1752_v9, %v1750_v7  ;;  %v1755_v11 = vpack.c.bf16 %v1753_v33, %v1751_v8 }
 0x1f4   :  { %1962 = vmatmul.bf16.vlgmr.msra.gmra.mxu1 %v1754_v10  ;;  %1976 = vmatmul.bf16.vlgmr.msra.gmra.mxu3 %v1755_v11 }
 0x1f5   :  { %1990 = vmatmul.bf16.vlgmr.msrb.gmra.mxu0 %v1754_v10  ;;  %2004 = vmatmul.bf16.vlgmr.msrb.gmra.mxu2 %v1755_v11 }
 0x271   :  { %v1963_v18 = vpop.f32.mrf.mxu1 }
 0x272   :  { %v1991_v20 = vpop.f32.mrf.mxu0  ;;  %v1964_v25 = vadd.f32 %v1963_v18, %v1790_v21 }
 0x273   :  { %v1992_v26 = vadd.f32 %v1991_v20, %v1791_v22 }
 0x277   :  { %v1977_v23 = vpop.f32.mrf.mxu3 }
 0x278   :  { %v2005_v24 = vpop.f32.mrf.mxu2  ;;  %v1978_v28 = vadd.f32 %v1977_v23, %v1964_v25 }
 0x279   :  { %v1965_v27 = vpop.f32.mrf.mxu1  ;;  %v2006_v30 = vadd.f32 %v2005_v24, %v1992_v26 }
 0x27a   :  { %v1993_v29 = vpop.f32.mrf.mxu0  ;;  %v1966_v31 = vadd.f32 %v1965_v27, %v1790_v21  ;;  %v2014_v35 = vmul.f32 0.01, %v1978_v28  ;;  %vm2010_vm10 = vcmp.gt.f32.partialorder %v1978_v28, 0.0 }
 0x27b   :  { %v1994_v32 = vadd.f32 %v1993_v29, %v1791_v22  ;;  %v2015_v39 = vmul.f32 0.01, %v2006_v30  ;;  %vm2011_vm11 = vcmp.gt.f32.partialorder %v2006_v30, 0.0 }
 0x27c   :  { %v2018_v51 = vsel %vm2010_vm10, %v1978_v28, %v2014_v35 }
 0x27d   :  { %v2019_v47 = vsel %vm2011_vm11, %v2006_v30, %v2015_v39 }
 0x27f   :  { %v1979_v34 = vpop.f32.mrf.mxu3 }
 0x280   :  { %v1980_v36 = vadd.f32 %v1979_v34, %v1966_v31  ;;  %v2007_v38 = vpop.f32.mrf.mxu2 }
 0x281   :  { %v2008_v40 = vadd.f32 %v2007_v38, %v1994_v32 }
 0x282   :  { %vm2012_vm12 = vcmp.gt.f32.partialorder %v1980_v36, 0.0  ;;  %v2016_v14 = vmul.f32 0.01, %v1980_v36 }
 0x283   :  { %vm2013_vm13 = vcmp.gt.f32.partialorder %v2008_v40, 0.0  ;;  %v2017_v44 = vmul.f32 0.01, %v2008_v40 }
 0x284   :  { %v2020_v46 = vsel %vm2012_vm12, %v1980_v36, %v2016_v14 }
 0x285   :  { %v2022_v48 = vpack.c.bf16 %v2020_v46, %v2018_v51  ;;  %v2021_v50 = vsel %vm2013_vm13, %v2008_v40, %v2017_v44 }
 0x286   :  { %v2023_v52 = vpack.c.bf16 %v2021_v50, %v2019_v47 }
 0x287   :  { %2164 = vmatmul.bf16.vlgmr.msrb.gmra.mxu1 %v2022_v48 }
 0x288   :  { %2178 = vmatmul.bf16.vlgmr.msrb.gmra.mxu3 %v2023_v52 }
 0x304   :  { %v2165_v53 = vpop.f32.mrf.mxu1 }
 0x305   :  { %v2166_v56 = vadd.f32 %v3456_v54, %v2165_v53 }
 0x30b   :  { %v2179_v55 = vpop.f32.mrf.mxu3 }
 0x30c   :  { %v2167_v57 = vpop.f32.mrf.mxu1  ;;  %v2180_v58 = vadd.f32 %v2179_v55, %v2166_v56 }
 0x30d   :  { %v2168_v37 = vadd.f32 %v3456_v54, %v2167_v57 }
 0x30e   :  { %v2186_v60 = vmul.f32 0.01, %v2180_v58  ;;  %vm2184_vm14 = vcmp.gt.f32.partialorder %v2180_v58, 0.0 }
 0x310   :  { %v2188_v3 = vsel %vm2184_vm14, %v2180_v58, %v2186_v60 }
 0x313   :  { %v2181_v59 = vpop.f32.mrf.mxu3 }
 0x314   :  { %v2182_v61 = vadd.f32 %v2181_v59, %v2168_v37 }
 0x316   :  { %vm2185_vm15 = vcmp.gt.f32.partialorder %v2182_v61, 0.0  ;;  %v2187_v62 = vmul.f32 0.01, %v2182_v61 }
 0x318   :  { %v2189_v63 = vsel %vm2185_vm15, %v2182_v61, %v2187_v62 }
 0x319   :  { %v3441_v0 = vpack.c.bf16 %v2189_v63, %v2188_v3 }
 0x31b   :  { %3442 = vst [vmem:[#allocation13] sm:$0xff] %v3441_v0  }
 0x31c   :  { %2206 = dma.vmem_to_hbm [thread:$0]  %s2199_s22, 128, %s2201_s24, [#allocation4], %s3645_s20, %s3645_s20, %s3646_s5  }
 0x31d   :  { %3633 = dma.done.wait [#allocation4], 128  }
 0x31e   :  { %3634 = vsyncadd [#allocation4], 4294967168 }
 0x31f   :  { %2211 = vsyncpa [#allocation3], 1 }
 0x320   :  { %2212 = vsyncpa [#allocation6], 1 }
 0x321   :  { %2213 = vsyncpa [#allocation9], 1 }
 0x322   :  { %2214 = vsyncpa [#allocation12], 1 }
 0x323   :  { %2215 = vsyncpa [#allocation4], 1 }

</bundles_post_ra>
